<compile_context>
chip_gen: v7x
topology: tpu7x:2x2x1
jax: 0.10.0
libtpu: 0.0.40
codegen_flags: <defaults>
</compile_context>

<pallas_src>
import math
import numpy as np
import jax
import jax.numpy as jnp
from jax.experimental import pallas as pl
from jax.experimental.pallas import tpu as pltpu

LANES = 128


def _wiener_kernel(params_ref, xre_ref, xim_ref, nre_ref, nim_ref, dph_ref,
                   ore_ref, oim_ref, carry_ref):
    awgn_scale = params_ref[0]     # sqrt(N0 / 2)
    sigma_phi = params_ref[1]
    start_phase = params_ref[2]

    # Initialize the running-phase carry on the first grid step.
    @pl.when(pl.program_id(0) == 0)
    def _():
        carry_ref[0] = start_phase

    d = sigma_phi * dph_ref[...]                     # (TM, 128) phase increments
    tm = d.shape[0]

    # --- hierarchical inclusive prefix sum over row-major element order -----
    # 1) per-row inclusive scan along the lane axis (Hillis-Steele, 7 steps).
    lane_idx = jax.lax.broadcasted_iota(jnp.int32, d.shape, 1)
    lane_scan = d
    shift = 1
    while shift < LANES:
        lane_scan = lane_scan + jnp.where(
            lane_idx >= shift, pltpu.roll(lane_scan, shift, axis=1), 0.0)
        shift *= 2

    # 2) exclusive scan of per-row totals along the sublane axis.
    row_tot = jnp.broadcast_to(jnp.sum(d, axis=1, keepdims=True), d.shape)
    row_idx = jax.lax.broadcasted_iota(jnp.int32, d.shape, 0)
    row_incl = row_tot
    shift = 1
    while shift < tm:
        row_incl = row_incl + jnp.where(
            row_idx >= shift, pltpu.roll(row_incl, shift, axis=0), 0.0)
        shift *= 2
    row_off = row_incl - row_tot                     # exclusive row prefix

    phi = carry_ref[0] + row_off + lane_scan         # inclusive cumsum + carry
    carry_ref[0] = carry_ref[0] + jnp.sum(d)         # carry into next block

    # --- AWGN + phase rotation ----------------------------------------------
    yre = xre_ref[...] + awgn_scale * nre_ref[...]
    yim = xim_ref[...] + awgn_scale * nim_ref[...]
    c = jnp.cos(phi)
    s = jnp.sin(phi)
    ore_ref[...] = yre * c - yim * s                 # dense full-block stores
    oim_ref[...] = yre * s + yim * c


def _round_up(a, b):
    return -(-a // b) * b


def wiener_phase_noise_pallas(x, n_re, n_im, dphi_n, N0, sigma_phi,
                              start_phase, tm=512):
    """Apply AWGN + Wiener phase noise to a 1-D complex signal.

    x: (N,) complex; n_re/n_im/dphi_n: (N,) standard-normal draws;
    N0: noise variance (or None to skip AWGN); sigma_phi, start_phase: scalars.
    """
    x = jnp.ravel(jnp.asarray(x))
    N = x.shape[0]
    r_raw = max(1, -(-N // LANES))
    # Power-of-two row tile (>= 8 sublanes), capped at `tm`.
    TM = min(int(tm), max(8, int(pl.next_power_of_2(r_raw))))
    R = _round_up(r_raw, TM)
    pad = R * LANES - N

    def plane(a):
        a = jnp.ravel(jnp.asarray(a)).astype(jnp.float32)
        return jnp.pad(a, (0, pad)).reshape(R, LANES)

    xre, xim = plane(jnp.real(x)), plane(jnp.imag(x))
    nre, nim, dph = plane(n_re), plane(n_im), plane(dphi_n)

    awgn_scale = (jnp.float32(0.0) if N0 is None
                  else jnp.sqrt(jnp.asarray(N0, jnp.float32) * 0.5))
    params = jnp.stack([awgn_scale,
                        jnp.asarray(sigma_phi, jnp.float32),
                        jnp.asarray(start_phase, jnp.float32)])

    blk = pl.BlockSpec((TM, LANES), lambda i: (i, 0))
    out_re, out_im = pl.pallas_call(
        _wiener_kernel,
        out_shape=(jax.ShapeDtypeStruct((R, LANES), jnp.float32),
                   jax.ShapeDtypeStruct((R, LANES), jnp.float32)),
        grid=(R // TM,),
        in_specs=[pl.BlockSpec(memory_space=pltpu.MemorySpace.SMEM),  # params (3,)
                  blk, blk, blk, blk, blk],
        out_specs=(blk, blk),
        scratch_shapes=[pltpu.SMEM((1,), jnp.float32)],               # phase carry
        compiler_params=pltpu.CompilerParams(
            dimension_semantics=("arbitrary",)),   # sequential: cumsum carry
    )(params, xre, xim, nre, nim, dph)

    out = (out_re + 1j * out_im).astype(jnp.complex64).reshape(-1)[:N]
    return out


def phasenoise_wiener(x, key, N0=None, sigma_phi=0.0,
                      start_phase_width=2.0 * np.pi, start_phase_init=0.0,
                      tm=512):
    """Module-style forward: draw the randomness, then run the Pallas kernel."""
    # TODO(synk): torch RNG (randn_/rand) has no matching Pallas equivalent;
    # randomness is drawn with jax.random in the wrapper and streamed into the
    # kernel so the kernel stays deterministic and verifiable.
    x = jnp.ravel(jnp.asarray(x))
    N = x.shape[0]
    k1, k2, k3, k4 = jax.random.split(key, 4)
    n_re = jax.random.normal(k1, (N,), jnp.float32)
    n_im = jax.random.normal(k2, (N,), jnp.float32)
    dphi = jax.random.normal(k3, (N,), jnp.float32)
    u = jax.random.uniform(k4, (), jnp.float32)
    start_phase = start_phase_init + u * start_phase_width
    return wiener_phase_noise_pallas(x, n_re, n_im, dphi, N0, sigma_phi,
                                     start_phase, tm=tm)


def _reference_numpy(x, n_re, n_im, dphi_n, N0, sigma_phi, start_phase):
    """Direct float64 port of PhasenoiseWiener.forward with injected noise."""
    x = np.asarray(x).astype(np.complex128).reshape(-1)
    if N0 is not None:
        n = np.asarray(n_re, np.float64) + 1j * np.asarray(n_im, np.float64)
        x = x + n * math.sqrt(N0 / 2.0)
    delta_phi = float(sigma_phi) * np.asarray(dphi_n, np.float64)
    phi = np.cumsum(delta_phi) + float(start_phase)
    return x * np.exp(1j * phi)


if __name__ == "__main__":
    # Small deterministic example: 5000 complex samples (non-multiple of 128
    # to exercise the padding path).
    N = 5000
    key = jax.random.PRNGKey(0)
    ks = jax.random.split(key, 6)
    sig = (jax.random.normal(ks[0], (N,), jnp.float32)
           + 1j * jax.random.normal(ks[1], (N,), jnp.float32)).astype(jnp.complex64)
    n_re = jax.random.normal(ks[2], (N,), jnp.float32)
    n_im = jax.random.normal(ks[3], (N,), jnp.float32)
    dphi = jax.random.normal(ks[4], (N,), jnp.float32)
    u = float(jax.random.uniform(ks[5], (), jnp.float32))

    N0 = 0.02
    sigma_phi = 0.01
    start_phase = 0.0 + u * (2.0 * np.pi)

    ref = _reference_numpy(np.asarray(sig), np.asarray(n_re), np.asarray(n_im),
                           np.asarray(dphi), N0, sigma_phi, start_phase)

    # Default large tile (single grid step at this small size).
    out1 = jax.block_until_ready(
        wiener_phase_noise_pallas(sig, n_re, n_im, dphi, N0, sigma_phi, start_phase))
    np.testing.assert_allclose(np.asarray(out1), ref, rtol=1e-3, atol=1e-3)

    # Small tile -> multiple sequential grid steps: exercises the SMEM phase carry.
    out2 = jax.block_until_ready(
        wiener_phase_noise_pallas(sig, n_re, n_im, dphi, N0, sigma_phi,
                                  start_phase, tm=8))
    np.testing.assert_allclose(np.asarray(out2), ref, rtol=1e-3, atol=1e-3)

    # Module-style forward (draws its own randomness) -- just run it.
    out3 = jax.block_until_ready(phasenoise_wiener(sig, key, N0=N0,
                                                   sigma_phi=sigma_phi))
    assert out3.shape == (N,) and out3.dtype == jnp.complex64

    print("KERNEL_OK")
</pallas_src>

<mosaic_0001>
module attributes {stable_mosaic.version = 11 : i64} {
  func.func @_wiener_kernel(%arg0: i32, %arg1: memref<3xf32, #tpu.memory_space<smem>>, %arg2: memref<64x128xf32, #tpu.memory_space<vmem>>, %arg3: memref<64x128xf32, #tpu.memory_space<vmem>>, %arg4: memref<64x128xf32, #tpu.memory_space<vmem>>, %arg5: memref<64x128xf32, #tpu.memory_space<vmem>>, %arg6: memref<64x128xf32, #tpu.memory_space<vmem>>, %arg7: memref<64x128xf32, #tpu.memory_space<vmem>>, %arg8: memref<64x128xf32, #tpu.memory_space<vmem>>, %arg9: memref<1xf32, #tpu.memory_space<smem>>) attributes {dimension_semantics = [#tpu.dimension_semantics<arbitrary>], iteration_bounds = array<i64: 1>, scalar_prefetch = 0 : i64, scratch_operands = 1 : i64, tpu.core_type = #tpu.core_type<tc>, window_params = [{transform_indices = @transform_0, window_bounds = array<i64: 3>}, {transform_indices = @transform_1, window_bounds = array<i64: 64, 128>}, {transform_indices = @transform_2, window_bounds = array<i64: 64, 128>}, {transform_indices = @transform_3, window_bounds = array<i64: 64, 128>}, {transform_indices = @transform_4, window_bounds = array<i64: 64, 128>}, {transform_indices = @transform_5, window_bounds = array<i64: 64, 128>}, {transform_indices = @transform_6, window_bounds = array<i64: 64, 128>}, {transform_indices = @transform_7, window_bounds = array<i64: 64, 128>}]} {
    %c0 = arith.constant 0 : index
    %0 = memref.load %arg1[%c0] : memref<3xf32, #tpu.memory_space<smem>>
    %c1 = arith.constant 1 : index
    %1 = memref.load %arg1[%c1] : memref<3xf32, #tpu.memory_space<smem>>
    %c2 = arith.constant 2 : index
    %2 = memref.load %arg1[%c2] : memref<3xf32, #tpu.memory_space<smem>>
    %c0_i32 = arith.constant 0 : i32
    %3 = arith.cmpi eq, %arg0, %c0_i32 : i32
    %4 = arith.extui %3 : i1 to i32
    %c0_i32_0 = arith.constant 0 : i32
    %5 = arith.cmpi ne, %4, %c0_i32_0 : i32
    scf.if %5 {
      %c0_51 = arith.constant 0 : index
      %125 = memref.load %arg9[%c0_51] : memref<1xf32, #tpu.memory_space<smem>>
      memref.store %2, %arg9[%c0_51] : memref<1xf32, #tpu.memory_space<smem>>
    } else {
    }
    %c0_1 = arith.constant 0 : index
    %c0_2 = arith.constant 0 : index
    %6 = vector.load %arg6[%c0_1, %c0_2] : memref<64x128xf32, #tpu.memory_space<vmem>>, vector<64x128xf32>
    %7 = vector.broadcast %1 : f32 to vector<64x128xf32>
    %8 = arith.mulf %7, %6 : vector<64x128xf32>
    %9 = tpu.iota {dimensions = array<i32: 1>} : vector<64x128xi32>
    %c1_i32 = arith.constant 1 : i32
    %10 = vector.broadcast %c1_i32 : i32 to vector<64x128xi32>
    %11 = arith.cmpi sge, %9, %10 : vector<64x128xi32>
    %c1_i32_3 = arith.constant 1 : i32
    %12 = tpu.dynamic_rotate %8 by %c1_i32_3 dim 1 : vector<64x128xf32>, i32 -> vector<64x128xf32>
    %cst = arith.constant 0.000000e+00 : f32
    %13 = vector.broadcast %cst : f32 to vector<64x128xf32>
    %14 = arith.select %11, %12, %13 : vector<64x128xi1>, vector<64x128xf32>
    %15 = arith.addf %8, %14 : vector<64x128xf32>
    %c2_i32 = arith.constant 2 : i32
    %16 = vector.broadcast %c2_i32 : i32 to vector<64x128xi32>
    %17 = arith.cmpi sge, %9, %16 : vector<64x128xi32>
    %c2_i32_4 = arith.constant 2 : i32
    %18 = tpu.dynamic_rotate %15 by %c2_i32_4 dim 1 : vector<64x128xf32>, i32 -> vector<64x128xf32>
    %cst_5 = arith.constant 0.000000e+00 : f32
    %19 = vector.broadcast %cst_5 : f32 to vector<64x128xf32>
    %20 = arith.select %17, %18, %19 : vector<64x128xi1>, vector<64x128xf32>
    %21 = arith.addf %15, %20 : vector<64x128xf32>
    %c4_i32 = arith.constant 4 : i32
    %22 = vector.broadcast %c4_i32 : i32 to vector<64x128xi32>
    %23 = arith.cmpi sge, %9, %22 : vector<64x128xi32>
    %c4_i32_6 = arith.constant 4 : i32
    %24 = tpu.dynamic_rotate %21 by %c4_i32_6 dim 1 : vector<64x128xf32>, i32 -> vector<64x128xf32>
    %cst_7 = arith.constant 0.000000e+00 : f32
    %25 = vector.broadcast %cst_7 : f32 to vector<64x128xf32>
    %26 = arith.select %23, %24, %25 : vector<64x128xi1>, vector<64x128xf32>
    %27 = arith.addf %21, %26 : vector<64x128xf32>
    %c8_i32 = arith.constant 8 : i32
    %28 = vector.broadcast %c8_i32 : i32 to vector<64x128xi32>
    %29 = arith.cmpi sge, %9, %28 : vector<64x128xi32>
    %c8_i32_8 = arith.constant 8 : i32
    %30 = tpu.dynamic_rotate %27 by %c8_i32_8 dim 1 : vector<64x128xf32>, i32 -> vector<64x128xf32>
    %cst_9 = arith.constant 0.000000e+00 : f32
    %31 = vector.broadcast %cst_9 : f32 to vector<64x128xf32>
    %32 = arith.select %29, %30, %31 : vector<64x128xi1>, vector<64x128xf32>
    %33 = arith.addf %27, %32 : vector<64x128xf32>
    %c16_i32 = arith.constant 16 : i32
    %34 = vector.broadcast %c16_i32 : i32 to vector<64x128xi32>
    %35 = arith.cmpi sge, %9, %34 : vector<64x128xi32>
    %c16_i32_10 = arith.constant 16 : i32
    %36 = tpu.dynamic_rotate %33 by %c16_i32_10 dim 1 : vector<64x128xf32>, i32 -> vector<64x128xf32>
    %cst_11 = arith.constant 0.000000e+00 : f32
    %37 = vector.broadcast %cst_11 : f32 to vector<64x128xf32>
    %38 = arith.select %35, %36, %37 : vector<64x128xi1>, vector<64x128xf32>
    %39 = arith.addf %33, %38 : vector<64x128xf32>
    %c32_i32 = arith.constant 32 : i32
    %40 = vector.broadcast %c32_i32 : i32 to vector<64x128xi32>
    %41 = arith.cmpi sge, %9, %40 : vector<64x128xi32>
    %c32_i32_12 = arith.constant 32 : i32
    %42 = tpu.dynamic_rotate %39 by %c32_i32_12 dim 1 : vector<64x128xf32>, i32 -> vector<64x128xf32>
    %cst_13 = arith.constant 0.000000e+00 : f32
    %43 = vector.broadcast %cst_13 : f32 to vector<64x128xf32>
    %44 = arith.select %41, %42, %43 : vector<64x128xi1>, vector<64x128xf32>
    %45 = arith.addf %39, %44 : vector<64x128xf32>
    %c64_i32 = arith.constant 64 : i32
    %46 = vector.broadcast %c64_i32 : i32 to vector<64x128xi32>
    %47 = arith.cmpi sge, %9, %46 : vector<64x128xi32>
    %c64_i32_14 = arith.constant 64 : i32
    %48 = tpu.dynamic_rotate %45 by %c64_i32_14 dim 1 : vector<64x128xf32>, i32 -> vector<64x128xf32>
    %cst_15 = arith.constant 0.000000e+00 : f32
    %49 = vector.broadcast %cst_15 : f32 to vector<64x128xf32>
    %50 = arith.select %47, %48, %49 : vector<64x128xi1>, vector<64x128xf32>
    %51 = arith.addf %45, %50 : vector<64x128xf32>
    %cst_16 = arith.constant dense<0.000000e+00> : vector<64xf32>
    %52 = vector.multi_reduction <add>, %8, %cst_16 [1] : vector<64x128xf32> to vector<64xf32>
    %53 = vector.shape_cast %52 : vector<64xf32> to vector<64x1xf32>
    %54 = vector.shape_cast %53 : vector<64x1xf32> to vector<64x1xf32>
    %55 = vector.broadcast %54 : vector<64x1xf32> to vector<64x128xf32>
    %56 = tpu.iota {dimensions = array<i32: 0>} : vector<64x128xi32>
    %c1_i32_17 = arith.constant 1 : i32
    %57 = vector.broadcast %c1_i32_17 : i32 to vector<64x128xi32>
    %58 = arith.cmpi sge, %56, %57 : vector<64x128xi32>
    %c1_i32_18 = arith.constant 1 : i32
    %59 = tpu.dynamic_rotate %55 by %c1_i32_18 dim 0 : vector<64x128xf32>, i32 -> vector<64x128xf32>
    %cst_19 = arith.constant 0.000000e+00 : f32
    %60 = vector.broadcast %cst_19 : f32 to vector<64x128xf32>
    %61 = arith.select %58, %59, %60 : vector<64x128xi1>, vector<64x128xf32>
    %62 = arith.addf %55, %61 : vector<64x128xf32>
    %c2_i32_20 = arith.constant 2 : i32
    %63 = vector.broadcast %c2_i32_20 : i32 to vector<64x128xi32>
    %64 = arith.cmpi sge, %56, %63 : vector<64x128xi32>
    %c2_i32_21 = arith.constant 2 : i32
    %65 = tpu.dynamic_rotate %62 by %c2_i32_21 dim 0 : vector<64x128xf32>, i32 -> vector<64x128xf32>
    %cst_22 = arith.constant 0.000000e+00 : f32
    %66 = vector.broadcast %cst_22 : f32 to vector<64x128xf32>
    %67 = arith.select %64, %65, %66 : vector<64x128xi1>, vector<64x128xf32>
    %68 = arith.addf %62, %67 : vector<64x128xf32>
    %c4_i32_23 = arith.constant 4 : i32
    %69 = vector.broadcast %c4_i32_23 : i32 to vector<64x128xi32>
    %70 = arith.cmpi sge, %56, %69 : vector<64x128xi32>
    %c4_i32_24 = arith.constant 4 : i32
    %71 = tpu.dynamic_rotate %68 by %c4_i32_24 dim 0 : vector<64x128xf32>, i32 -> vector<64x128xf32>
    %cst_25 = arith.constant 0.000000e+00 : f32
    %72 = vector.broadcast %cst_25 : f32 to vector<64x128xf32>
    %73 = arith.select %70, %71, %72 : vector<64x128xi1>, vector<64x128xf32>
    %74 = arith.addf %68, %73 : vector<64x128xf32>
    %c8_i32_26 = arith.constant 8 : i32
    %75 = vector.broadcast %c8_i32_26 : i32 to vector<64x128xi32>
    %76 = arith.cmpi sge, %56, %75 : vector<64x128xi32>
    %c8_i32_27 = arith.constant 8 : i32
    %77 = tpu.dynamic_rotate %74 by %c8_i32_27 dim 0 : vector<64x128xf32>, i32 -> vector<64x128xf32>
    %cst_28 = arith.constant 0.000000e+00 : f32
    %78 = vector.broadcast %cst_28 : f32 to vector<64x128xf32>
    %79 = arith.select %76, %77, %78 : vector<64x128xi1>, vector<64x128xf32>
    %80 = arith.addf %74, %79 : vector<64x128xf32>
    %c16_i32_29 = arith.constant 16 : i32
    %81 = vector.broadcast %c16_i32_29 : i32 to vector<64x128xi32>
    %82 = arith.cmpi sge, %56, %81 : vector<64x128xi32>
    %c16_i32_30 = arith.constant 16 : i32
    %83 = tpu.dynamic_rotate %80 by %c16_i32_30 dim 0 : vector<64x128xf32>, i32 -> vector<64x128xf32>
    %cst_31 = arith.constant 0.000000e+00 : f32
    %84 = vector.broadcast %cst_31 : f32 to vector<64x128xf32>
    %85 = arith.select %82, %83, %84 : vector<64x128xi1>, vector<64x128xf32>
    %86 = arith.addf %80, %85 : vector<64x128xf32>
    %c32_i32_32 = arith.constant 32 : i32
    %87 = vector.broadcast %c32_i32_32 : i32 to vector<64x128xi32>
    %88 = arith.cmpi sge, %56, %87 : vector<64x128xi32>
    %c32_i32_33 = arith.constant 32 : i32
    %89 = tpu.dynamic_rotate %86 by %c32_i32_33 dim 0 : vector<64x128xf32>, i32 -> vector<64x128xf32>
    %cst_34 = arith.constant 0.000000e+00 : f32
    %90 = vector.broadcast %cst_34 : f32 to vector<64x128xf32>
    %91 = arith.select %88, %89, %90 : vector<64x128xi1>, vector<64x128xf32>
    %92 = arith.addf %86, %91 : vector<64x128xf32>
    %93 = arith.subf %92, %55 : vector<64x128xf32>
    %c0_35 = arith.constant 0 : index
    %94 = memref.load %arg9[%c0_35] : memref<1xf32, #tpu.memory_space<smem>>
    %95 = vector.broadcast %94 : f32 to vector<64x128xf32>
    %96 = arith.addf %95, %93 : vector<64x128xf32>
    %97 = arith.addf %96, %51 : vector<64x128xf32>
    %c0_36 = arith.constant 0 : index
    %98 = memref.load %arg9[%c0_36] : memref<1xf32, #tpu.memory_space<smem>>
    %99 = vector.shape_cast %8 : vector<64x128xf32> to vector<1x64x128xf32>
    %cst_37 = arith.constant dense<0.000000e+00> : vector<1xf32>
    %100 = vector.multi_reduction <add>, %99, %cst_37 [1, 2] : vector<1x64x128xf32> to vector<1xf32>
    %101 = vector.shape_cast %100 : vector<1xf32> to vector<1x1x1xf32>
    %102 = vector.extract %101[0, 0, 0] : f32 from vector<1x1x1xf32>
    %103 = arith.addf %98, %102 : f32
    %c0_38 = arith.constant 0 : index
    %104 = memref.load %arg9[%c0_38] : memref<1xf32, #tpu.memory_space<smem>>
    memref.store %103, %arg9[%c0_38] : memref<1xf32, #tpu.memory_space<smem>>
    %c0_39 = arith.constant 0 : index
    %c0_40 = arith.constant 0 : index
    %105 = vector.load %arg2[%c0_39, %c0_40] : memref<64x128xf32, #tpu.memory_space<vmem>>, vector<64x128xf32>
    %c0_41 = arith.constant 0 : index
    %c0_42 = arith.constant 0 : index
    %106 = vector.load %arg4[%c0_41, %c0_42] : memref<64x128xf32, #tpu.memory_space<vmem>>, vector<64x128xf32>
    %107 = vector.broadcast %0 : f32 to vector<64x128xf32>
    %108 = arith.mulf %107, %106 : vector<64x128xf32>
    %109 = arith.addf %105, %108 : vector<64x128xf32>
    %c0_43 = arith.constant 0 : index
    %c0_44 = arith.constant 0 : index
    %110 = vector.load %arg3[%c0_43, %c0_44] : memref<64x128xf32, #tpu.memory_space<vmem>>, vector<64x128xf32>
    %c0_45 = arith.constant 0 : index
    %c0_46 = arith.constant 0 : index
    %111 = vector.load %arg5[%c0_45, %c0_46] : memref<64x128xf32, #tpu.memory_space<vmem>>, vector<64x128xf32>
    %112 = vector.broadcast %0 : f32 to vector<64x128xf32>
    %113 = arith.mulf %112, %111 : vector<64x128xf32>
    %114 = arith.addf %110, %113 : vector<64x128xf32>
    %115 = math.cos %97 : vector<64x128xf32>
    %116 = math.sin %97 : vector<64x128xf32>
    %117 = arith.mulf %109, %115 : vector<64x128xf32>
    %118 = arith.mulf %114, %116 : vector<64x128xf32>
    %119 = arith.subf %117, %118 : vector<64x128xf32>
    %c0_47 = arith.constant 0 : index
    %c0_48 = arith.constant 0 : index
    %120 = vector.load %arg7[%c0_47, %c0_48] : memref<64x128xf32, #tpu.memory_space<vmem>>, vector<64x128xf32>
    tpu.vector_store %arg7[%c0_47, %c0_48], %119 {strides = array<i32>} : memref<64x128xf32, #tpu.memory_space<vmem>>, vector<64x128xf32>,
    %121 = arith.mulf %109, %116 : vector<64x128xf32>
    %122 = arith.mulf %114, %115 : vector<64x128xf32>
    %123 = arith.addf %121, %122 : vector<64x128xf32>
    %c0_49 = arith.constant 0 : index
    %c0_50 = arith.constant 0 : index
    %124 = vector.load %arg8[%c0_49, %c0_50] : memref<64x128xf32, #tpu.memory_space<vmem>>, vector<64x128xf32>
    tpu.vector_store %arg8[%c0_49, %c0_50], %123 {strides = array<i32>} : memref<64x128xf32, #tpu.memory_space<vmem>>, vector<64x128xf32>,
    return
  }
  func.func @transform_0(%arg0: i32) -> i32 {
    %c0_i32 = arith.constant 0 : i32
    %c0_i32_0 = arith.constant 0 : i32
    return %c0_i32 : i32
  }
  func.func @transform_1(%arg0: i32) -> (i32, i32) {
    %c0_i32 = arith.constant 0 : i32
    %c0_i32_0 = arith.constant 0 : i32
    return %arg0, %c0_i32 : i32, i32
  }
  func.func @transform_2(%arg0: i32) -> (i32, i32) {
    %c0_i32 = arith.constant 0 : i32
    %c0_i32_0 = arith.constant 0 : i32
    return %arg0, %c0_i32 : i32, i32
  }
  func.func @transform_3(%arg0: i32) -> (i32, i32) {
    %c0_i32 = arith.constant 0 : i32
    %c0_i32_0 = arith.constant 0 : i32
    return %arg0, %c0_i32 : i32, i32
  }
  func.func @transform_4(%arg0: i32) -> (i32, i32) {
    %c0_i32 = arith.constant 0 : i32
    %c0_i32_0 = arith.constant 0 : i32
    return %arg0, %c0_i32 : i32, i32
  }
  func.func @transform_5(%arg0: i32) -> (i32, i32) {
    %c0_i32 = arith.constant 0 : i32
    %c0_i32_0 = arith.constant 0 : i32
    return %arg0, %c0_i32 : i32, i32
  }
  func.func @transform_6(%arg0: i32) -> (i32, i32) {
    %c0_i32 = arith.constant 0 : i32
    %c0_i32_0 = arith.constant 0 : i32
    return %arg0, %c0_i32 : i32, i32
  }
  func.func @transform_7(%arg0: i32) -> (i32, i32) {
    %c0_i32 = arith.constant 0 : i32
    %c0_i32_0 = arith.constant 0 : i32
    return %arg0, %c0_i32 : i32, i32
  }
}

</mosaic_0001>

<bundles_post_ra>
// kernel: tpu_custom_call.1
= control target key start
LH: loop header
LB: loop body
LE: loop exit
PB: predicated region body
PF: predicated region fallthrough
CT: control target
= control target key end

     0   :  { %13 = vsyncpa [#allocation6], 0  ;;  %s4220_s0 = inlined_call_operand.hbm [shape: f32[3], index: 0, kind: input, shape index: {}]   ;;  %s4221_s1 = inlined_call_operand.hbm [shape: f32[64,128], index: 1, kind: input, shape index: {}]   ;;  %s4222_s2 = inlined_call_operand.hbm [shape: f32[64,128], index: 2, kind: input, shape index: {}]   ;;  %s4223_s3 = inlined_call_operand.hbm [shape: f32[64,128], index: 3, kind: input, shape index: {}]   ;;  %s4224_s4 = inlined_call_operand.hbm [shape: f32[64,128], index: 4, kind: input, shape index: {}]   ;;  %s4225_s5 = inlined_call_operand.hbm [shape: f32[64,128], index: 5, kind: input, shape index: {}]   ;;  %s4226_s6 = inlined_call_operand.hbm [shape: f32[64,128], index: 6, kind: output, shape index: {0}]   ;;  %s4227_s7 = inlined_call_operand.hbm [shape: f32[64,128], index: 7, kind: output, shape index: {1}]  }
   0x1   :  { %14 = vsyncpa [#allocation4], 0 }
   0x2   :  { %15 = vsyncpa [#allocation9], 0 }
   0x3   :  { %16 = vsyncpa [#allocation12], 0 }
   0x4   :  { %17 = vsyncpa [#allocation5], 0 }
   0x5   :  { %18 = vsyncpa [#allocation16], 0  ;;  %s2779_s24 = smov [#allocation8]   ;;  %s2780_s26 = smov [#allocation11]  }
   0x6   :  { %s44_s25 = sshll.u32 %s2779_s24, 4  ;;  %s68_s27 = sshll.u32 %s2780_s26, 4  ;;  %s45_s25 = int_to_ptr.vmem [resolvable:$true] %s44_s25  ;;  %s2841_s27 = int_to_ptr.vmem [resolvable:$true] %s68_s27 }
   0x7   :  { %s2603_s30 = scalar_lea.hbm %s4222_s2, 1024 }
   0x8   :  { %p2604_p0 = scmp.ne.s32.totalorder %s4222_s2, %s2603_s30  ;;  %p2607_p1 = scmp.lt.u32.totalorder %s2603_s30, %s4222_s2 }
   0xa   :  { %p2609_p2 = pnand %p2607_p1, %p2604_p0 }
   0xc   :  { %2612 = shalt.err (!%p2609_p2)
}
   0xd   :  { %s2613_s12 = scalar_lea.vmem %s45_s25, 1024  ;;  %p2618_p4 = scmp.lt.s32.totalorder %s45_s25, %s45_s25 }
   0xe   :  { %p2614_p3 = scmp.ne.s32.totalorder %s45_s25, %s2613_s12  ;;  %p2619_p5 = scmp.lt.s32.totalorder %s2613_s12, %s2613_s12 }
  0x10   :  { %p2620_p6 = por %p2619_p5, %p2618_p4 }
  0x12   :  { %p2621_p7 = pnand %p2620_p6, %p2614_p3 }
  0x14   :  { %2624 = shalt.err (!%p2621_p7)
}
  0x15   :  { %s2781_s13 = smov 128   ;;  %s2782_s14 = smov 8  }
  0x16   :  { %50 = dma.hbm_to_vmem [thread:$0]  %s4222_s2, 1024, %s45_s25, [#allocation9], %s2781_s13, %s2781_s13, %s2782_s14  }
  0x17   :  { %s2625_s19 = scalar_lea.hbm %s4224_s4, 1024 }
  0x18   :  { %p2626_p8 = scmp.ne.s32.totalorder %s4224_s4, %s2625_s19  ;;  %p2629_p9 = scmp.lt.u32.totalorder %s2625_s19, %s4224_s4 }
  0x1a   :  { %p2631_p10 = pnand %p2629_p9, %p2626_p8 }
  0x1c   :  { %2634 = shalt.err (!%p2631_p10)
}
  0x1d   :  { %s2635_s24 = scalar_lea.vmem %s2841_s27, 1024  ;;  %p2640_p12 = scmp.lt.s32.totalorder %s2841_s27, %s2841_s27 }
  0x1e   :  { %p2636_p11 = scmp.ne.s32.totalorder %s2841_s27, %s2635_s24  ;;  %p2641_p13 = scmp.lt.s32.totalorder %s2635_s24, %s2635_s24 }
  0x20   :  { %p2642_p0 = por %p2641_p13, %p2640_p12 }
  0x22   :  { %p2643_p1 = pnand %p2642_p0, %p2636_p11 }
  0x24   :  { %2646 = shalt.err (!%p2643_p1)
}
  0x25   :  { %74 = dma.hbm_to_vmem [thread:$0]  %s4224_s4, 1024, %s2841_s27, [#allocation12], %s2781_s13, %s2781_s13, %s2782_s14  }
  0x26   :  { %s2647_s29 = scalar_lea.hbm %s4220_s0, 16 }
  0x27   :  { %p2648_p2 = scmp.ne.s32.totalorder %s4220_s0, %s2647_s29  ;;  %p2651_p3 = scmp.lt.u32.totalorder %s2647_s29, %s4220_s0 }
  0x29   :  { %p2653_p4 = pnand %p2651_p3, %p2648_p2 }
  0x2b   :  { %2656 = shalt.err (!%p2653_p4)
}
  0x2c   :  { %s2783_s11 = smov [#allocation3]   ;;  %s2784_s4 = smov [#allocation7]  }
  0x2d   :  { %26 = dma.hbm_to_smem %s4220_s0, 16, %s2783_s11, [#allocation6]  }
  0x2e   :  { %s32_s27 = sshll.u32 %s2784_s4, 4  ;;  %s2785_s16 = smov [#allocation10]   ;;  %s33_s27 = int_to_ptr.vmem [resolvable:$true] %s32_s27 }
  0x2f   :  { %s56_s17 = sshll.u32 %s2785_s16, 4  ;;  %s2657_s20 = scalar_lea.hbm %s4221_s1, 1024  ;;  %s57_s17 = int_to_ptr.vmem [resolvable:$true] %s56_s17 }
  0x30   :  { %p2658_p5 = scmp.ne.s32.totalorder %s4221_s1, %s2657_s20  ;;  %p2661_p6 = scmp.lt.u32.totalorder %s2657_s20, %s4221_s1 }
  0x32   :  { %p2663_p7 = pnand %p2661_p6, %p2658_p5 }
  0x34   :  { %2666 = shalt.err (!%p2663_p7)
}
  0x35   :  { %s2667_s0 = scalar_lea.vmem %s33_s27, 1024  ;;  %p2672_p9 = scmp.lt.s32.totalorder %s33_s27, %s33_s27 }
  0x36   :  { %p2668_p8 = scmp.ne.s32.totalorder %s33_s27, %s2667_s0  ;;  %p2673_p10 = scmp.lt.s32.totalorder %s2667_s0, %s2667_s0 }
  0x38   :  { %p2674_p11 = por %p2673_p10, %p2672_p9 }
  0x3a   :  { %p2675_p12 = pnand %p2674_p11, %p2668_p8 }
  0x3c   :  { %2678 = shalt.err (!%p2675_p12)
}
  0x3d   :  { %38 = dma.hbm_to_vmem [thread:$0]  %s4221_s1, 1024, %s33_s27, [#allocation4], %s2781_s13, %s2781_s13, %s2782_s14  }
  0x3e   :  { %s2679_s29 = scalar_lea.hbm %s4223_s3, 1024 }
  0x3f   :  { %p2680_p13 = scmp.ne.s32.totalorder %s4223_s3, %s2679_s29  ;;  %p2683_p0 = scmp.lt.u32.totalorder %s2679_s29, %s4223_s3 }
  0x41   :  { %p2685_p1 = pnand %p2683_p0, %p2680_p13 }
  0x43   :  { %2688 = shalt.err (!%p2685_p1)
}
  0x44   :  { %s2689_s11 = scalar_lea.vmem %s57_s17, 1024  ;;  %p2694_p3 = scmp.lt.s32.totalorder %s57_s17, %s57_s17 }
  0x45   :  { %p2690_p2 = scmp.ne.s32.totalorder %s57_s17, %s2689_s11  ;;  %p2695_p4 = scmp.lt.s32.totalorder %s2689_s11, %s2689_s11 }
  0x47   :  { %p2696_p5 = por %p2695_p4, %p2694_p3 }
  0x49   :  { %p2697_p6 = pnand %p2696_p5, %p2690_p2 }
  0x4b   :  { %2700 = shalt.err (!%p2697_p6)
}
  0x4c   :  { %62 = dma.hbm_to_vmem [thread:$0]  %s4223_s3, 1024, %s57_s17, [#allocation9], %s2781_s13, %s2781_s13, %s2782_s14  }
  0x4d   :  { %s2786_s15 = smov [#allocation13]   ;;  %s2701_s18 = scalar_lea.hbm %s4225_s5, 1024 }
  0x4e   :  { %s80_s4 = sshll.u32 %s2786_s15, 4  ;;  %p2702_p7 = scmp.ne.s32.totalorder %s4225_s5, %s2701_s18  ;;  %s81_s4 = int_to_ptr.vmem [resolvable:$true] %s80_s4 }
  0x4f   :  { %p2705_p8 = scmp.lt.u32.totalorder %s2701_s18, %s4225_s5 }
  0x51   :  { %p2707_p9 = pnand %p2705_p8, %p2702_p7 }
  0x53   :  { %2710 = shalt.err (!%p2707_p9)
}
  0x54   :  { %s2711_s23 = scalar_lea.vmem %s81_s4, 1024  ;;  %p2716_p11 = scmp.lt.s32.totalorder %s81_s4, %s81_s4 }
  0x55   :  { %p2712_p10 = scmp.ne.s32.totalorder %s81_s4, %s2711_s23  ;;  %p2717_p12 = scmp.lt.s32.totalorder %s2711_s23, %s2711_s23 }
  0x57   :  { %p2718_p13 = por %p2717_p12, %p2716_p11 }
  0x59   :  { %p2719_p0 = pnand %p2718_p13, %p2712_p10 }
  0x5b   :  { %2722 = shalt.err (!%p2719_p0)
}
  0x5c   :  { %86 = dma.hbm_to_vmem [thread:$0]  %s4225_s5, 1024, %s81_s4, [#allocation12], %s2781_s13, %s2781_s13, %s2782_s14  }
  0x5d   :  { %2767 = dma.done.wait [#allocation6], 16  }
  0x5e   :  { %2768 = vsyncadd [#allocation6], 4294967280 }
  0x5f   :  { %2769 = dma.done.wait [#allocation4], 1024  }
  0x60   :  { %2770 = vsyncadd [#allocation4], 4294966272 }
  0x61   :  { %2771 = dma.done.wait [#allocation9], 2048  }
  0x62   :  { %2772 = vsyncadd [#allocation9], 4294965248 }
  0x63   :  { %2773 = dma.done.wait [#allocation12], 2048  }
  0x64   :  { %2774 = vsyncadd [#allocation12], 4294965248 }
  0x65   :  { %105 = sfence }
  0x66   :  { %s2451_s24 = sld [smem:[#allocation3 + $0x1]]  ;;  %v115_v0 = vld [vmem:[#allocation13] sm:$0xff]  ;;  %v117_v1 = vld [vmem:[#allocation13 + $0x10] sm:$0xff]  ;;  %v116_v3 = vld [vmem:[#allocation13 + $0x8] sm:$0xff]  ;;  %s2787_s5 = smov 1   ;;  %v132_v17 = vlaneseq }
  0x67   :  { %v118_v4 = vld [vmem:[#allocation13 + $0x18] sm:$0xff]  ;;  %v119_v9 = vld [vmem:[#allocation13 + $0x20] sm:$0xff]  ;;  %v120_v10 = vld [vmem:[#allocation13 + $0x28] sm:$0xff]  ;;  %s2788_s0 = smov 2   ;;  %s2789_s2 = smov 4  }
  0x68   :  { %v121_v13 = vld [vmem:[#allocation13 + $0x30] sm:$0xff]  ;;  %v122_v14 = vld [vmem:[#allocation13 + $0x38] sm:$0xff]  ;;  %v2960_v18 = vand.u32 127, %v132_v17  ;;  %s2790_s25 = smov 16   ;;  %s2791_s26 = smov 32  }
  0x69   :  { %s2792_s28 = smov 64   ;;  %s2452_s29 = sld [smem:[#allocation3 + $0x2]] }
  0x6a   :  { %vm134_vm0 = vcmp.ge.s32.totalorder %v2960_v18, 1  ;;  %vm167_vm1 = vcmp.ge.s32.totalorder %v2960_v18, 2  ;;  %vm200_vm2 = vcmp.ge.s32.totalorder %v2960_v18, 4  ;;  %vm233_vm3 = vcmp.ge.s32.totalorder %v2960_v18, 8  ;;  %s106_s30 = sld [smem:[#allocation3]]  ;;  %s2799_s8 = smov [#allocation14]  }
  0x6b   :  { %vm266_vm4 = vcmp.ge.s32.totalorder %v2960_v18, 16  ;;  %vm299_vm10 = vcmp.ge.s32.totalorder %v2960_v18, 32  ;;  %vm332_vm12 = vcmp.ge.s32.totalorder %v2960_v18, 64  ;;  %s2420_s9 = sshll.u32 %s2799_s8, 4  ;;  %s2800_s10 = smov [#allocation15]   ;;  %s2421_s9 = int_to_ptr.vmem [resolvable:$true] %s2420_s9 }
  0x6c   :  { %v123_v2 = vstv %s2451_s24  ;;  %s2432_s11 = sshll.u32 %s2800_s10, 4  ;;  %s2723_s1 = scalar_lea.vmem %s2421_s9, 1024  ;;  %s4183_s11 = int_to_ptr.vmem [resolvable:$true] %s2432_s11 }
  0x6d   :  { %v2935_v5 = vmul.f32 %v123_v2, %v115_v0  ;;  %v2937_v6 = vmul.f32 %v123_v2, %v117_v1  ;;  %v2941_v7 = vmul.f32 %v123_v2, %v116_v3  ;;  %v2943_v8 = vmul.f32 %v123_v2, %v118_v4  ;;  %p2724_p1 = scmp.ne.s32.totalorder %s2421_s9, %s2723_s1  ;;  %p2728_p2 = scmp.lt.s32.totalorder %s2421_s9, %s2421_s9 }
  0x6e   :  { %v2947_v11 = vmul.f32 %v123_v2, %v119_v9  ;;  %v2949_v12 = vmul.f32 %v123_v2, %v120_v10  ;;  %v2953_v15 = vmul.f32 %v123_v2, %v121_v13  ;;  %v2955_v16 = vmul.f32 %v123_v2, %v122_v14  ;;  %p2729_p3 = scmp.lt.s32.totalorder %s2723_s1, %s2723_s1 }
  0x6f   :  { %135 = vrot.lane.b32.xlu0 %v2935_v5, %s2787_s5  ;;  %139 = vrot.lane.b32.xlu1 %v2937_v6, %s2787_s5 }
  0x70   :  { %p2730_p4 = por %p2729_p3, %p2728_p2 }
  0x72   :  { %p2731_p5 = pnand %p2730_p4, %p2724_p1 }
  0x73   :  { %137 = vrot.lane.b32.xlu0 %v2941_v7, %s2787_s5  ;;  %141 = vrot.lane.b32.xlu1 %v2943_v8, %s2787_s5 }
  0x77   :  { %143 = vrot.lane.b32.xlu0 %v2947_v11, %s2787_s5  ;;  %145 = vrot.lane.b32.xlu1 %v2949_v12, %s2787_s5 }
  0x7b   :  { %147 = vrot.lane.b32.xlu0 %v2953_v15, %s2787_s5  ;;  %149 = vrot.lane.b32.xlu1 %v2955_v16, %s2787_s5 }
  0xe1   :  { %v136_v19 = vpop.permute.xlu0 %135  ;;  %v140_v20 = vpop.permute.xlu1 %139 }
  0xe2   :  { %v151_v21 = vsel %vm134_vm0, %v136_v19, 0.0  ;;  %v153_v22 = vsel %vm134_vm0, %v140_v20, 0.0 }
  0xe3   :  { %v159_v23 = vadd.f32 %v151_v21, %v2935_v5  ;;  %v161_v24 = vadd.f32 %v153_v22, %v2937_v6 }
  0xe5   :  { %168 = vrot.lane.b32.xlu0 %v159_v23, %s2788_s0  ;;  %v138_v25 = vpop.permute.xlu0 %137  ;;  %v142_v26 = vpop.permute.xlu1 %141 }
  0xe6   :  { %v152_v27 = vsel %vm134_vm0, %v138_v25, 0.0  ;;  %v154_v28 = vsel %vm134_vm0, %v142_v26, 0.0 }
  0xe7   :  { %v160_v29 = vadd.f32 %v152_v27, %v2941_v7  ;;  %v162_v30 = vadd.f32 %v154_v28, %v2943_v8 }
  0xe9   :  { %172 = vrot.lane.b32.xlu0 %v161_v24, %s2788_s0  ;;  %170 = vrot.lane.b32.xlu1 %v160_v29, %s2788_s0  ;;  %v144_v31 = vpop.permute.xlu0 %143  ;;  %v146_v32 = vpop.permute.xlu1 %145 }
  0xea   :  { %v155_v33 = vsel %vm134_vm0, %v144_v31, 0.0  ;;  %v156_v34 = vsel %vm134_vm0, %v146_v32, 0.0 }
  0xeb   :  { %v163_v35 = vadd.f32 %v155_v33, %v2947_v11  ;;  %v164_v36 = vadd.f32 %v156_v34, %v2949_v12 }
  0xed   :  { %174 = vrot.lane.b32.xlu1 %v162_v30, %s2788_s0  ;;  %176 = vrot.lane.b32.xlu0 %v163_v35, %s2788_s0  ;;  %v148_v37 = vpop.permute.xlu0 %147  ;;  %v150_v38 = vpop.permute.xlu1 %149 }
  0xee   :  { %v157_v39 = vsel %vm134_vm0, %v148_v37, 0.0  ;;  %v158_v40 = vsel %vm134_vm0, %v150_v38, 0.0 }
  0xef   :  { %v165_v41 = vadd.f32 %v157_v39, %v2953_v15  ;;  %v166_v42 = vadd.f32 %v158_v40, %v2955_v16 }
  0xf1   :  { %178 = vrot.lane.b32.xlu1 %v164_v36, %s2788_s0  ;;  %180 = vrot.lane.b32.xlu0 %v165_v41, %s2788_s0 }
  0xf5   :  { %182 = vrot.lane.b32.xlu1 %v166_v42, %s2788_s0 }
 0x157   :  { %v169_v43 = vpop.permute.xlu0 %168 }
 0x158   :  { %v184_v44 = vsel %vm167_vm1, %v169_v43, 0.0 }
 0x159   :  { %v192_v45 = vadd.f32 %v184_v44, %v159_v23 }
 0x15b   :  { %v171_v46 = vpop.permute.xlu1 %170  ;;  %201 = vrot.lane.b32.xlu0 %v192_v45, %s2789_s2  ;;  %v173_v47 = vpop.permute.xlu0 %172 }
 0x15c   :  { %v185_v48 = vsel %vm167_vm1, %v171_v46, 0.0  ;;  %v186_v49 = vsel %vm167_vm1, %v173_v47, 0.0 }
 0x15d   :  { %v193_v50 = vadd.f32 %v185_v48, %v160_v29  ;;  %v194_v51 = vadd.f32 %v186_v49, %v161_v24 }
 0x15f   :  { %203 = vrot.lane.b32.xlu1 %v193_v50, %s2789_s2  ;;  %v175_v52 = vpop.permute.xlu1 %174  ;;  %205 = vrot.lane.b32.xlu0 %v194_v51, %s2789_s2  ;;  %v177_v53 = vpop.permute.xlu0 %176 }
 0x160   :  { %v187_v54 = vsel %vm167_vm1, %v175_v52, 0.0  ;;  %v188_v55 = vsel %vm167_vm1, %v177_v53, 0.0 }
 0x161   :  { %v195_v56 = vadd.f32 %v187_v54, %v162_v30  ;;  %v196_v57 = vadd.f32 %v188_v55, %v163_v35 }
 0x163   :  { %207 = vrot.lane.b32.xlu1 %v195_v56, %s2789_s2  ;;  %v179_v58 = vpop.permute.xlu1 %178  ;;  %209 = vrot.lane.b32.xlu0 %v196_v57, %s2789_s2  ;;  %v181_v59 = vpop.permute.xlu0 %180 }
 0x164   :  { %v189_v60 = vsel %vm167_vm1, %v179_v58, 0.0  ;;  %v190_v61 = vsel %vm167_vm1, %v181_v59, 0.0 }
 0x165   :  { %v197_v62 = vadd.f32 %v189_v60, %v164_v36  ;;  %v198_v63 = vadd.f32 %v190_v61, %v165_v41 }
 0x167   :  { %211 = vrot.lane.b32.xlu1 %v197_v62, %s2789_s2  ;;  %v183_v0 = vpop.permute.xlu1 %182  ;;  %213 = vrot.lane.b32.xlu0 %v198_v63, %s2789_s2 }
 0x168   :  { %v191_v1 = vsel %vm167_vm1, %v183_v0, 0.0 }
 0x169   :  { %v199_v2 = vadd.f32 %v191_v1, %v166_v42 }
 0x16b   :  { %215 = vrot.lane.b32.xlu1 %v199_v2, %s2789_s2 }
 0x186   :  { %365 = vadd.xlane.f32.xlu0 %v2935_v5 }
 0x1cd   :  { %v202_v3 = vpop.permute.xlu0 %201 }
 0x1ce   :  { %v217_v4 = vsel %vm200_vm2, %v202_v3, 0.0 }
 0x1cf   :  { %v225_v9 = vadd.f32 %v217_v4, %v192_v45 }
 0x1d1   :  { %v204_v10 = vpop.permute.xlu1 %203  ;;  %234 = vrot.lane.b32.xlu0 %v225_v9, %s2782_s14  ;;  %v206_v13 = vpop.permute.xlu0 %205 }
 0x1d2   :  { %v218_v14 = vsel %vm200_vm2, %v204_v10, 0.0  ;;  %v219_v19 = vsel %vm200_vm2, %v206_v13, 0.0 }
 0x1d3   :  { %v226_v20 = vadd.f32 %v218_v14, %v193_v50  ;;  %v227_v21 = vadd.f32 %v219_v19, %v194_v51 }
 0x1d5   :  { %236 = vrot.lane.b32.xlu1 %v226_v20, %s2782_s14  ;;  %v208_v5 = vpop.permute.xlu1 %207  ;;  %238 = vrot.lane.b32.xlu0 %v227_v21, %s2782_s14  ;;  %v210_v22 = vpop.permute.xlu0 %209 }
 0x1d6   :  { %v220_v23 = vsel %vm200_vm2, %v208_v5, 0.0  ;;  %v221_v24 = vsel %vm200_vm2, %v210_v22, 0.0 }
 0x1d7   :  { %v228_v25 = vadd.f32 %v220_v23, %v195_v56  ;;  %v229_v26 = vadd.f32 %v221_v24, %v196_v57 }
 0x1d9   :  { %240 = vrot.lane.b32.xlu1 %v228_v25, %s2782_s14  ;;  %v212_v27 = vpop.permute.xlu1 %211  ;;  %242 = vrot.lane.b32.xlu0 %v229_v26, %s2782_s14  ;;  %v214_v28 = vpop.permute.xlu0 %213 }
 0x1da   :  { %v222_v29 = vsel %vm200_vm2, %v212_v27, 0.0  ;;  %v223_v30 = vsel %vm200_vm2, %v214_v28, 0.0  ;;  %v3104_v28 = vshrl.u32 %v132_v17, 7 }
 0x1db   :  { %v230_v31 = vadd.f32 %v222_v29, %v197_v62  ;;  %v231_v32 = vadd.f32 %v223_v30, %v198_v63 }
 0x1dc   :  { %vm406_vm5 = vcmp.lt.s32.totalorder %v3104_v28, 1  ;;  %vm390_vm6 = vcmp.ge.s32.totalorder %v3104_v28, 1  ;;  %vm447_vm7 = vcmp.lt.s32.totalorder %v3104_v28, 2  ;;  %vm431_vm8 = vcmp.ge.s32.totalorder %v3104_v28, 2 }
 0x1dd   :  { %244 = vrot.lane.b32.xlu1 %v230_v31, %s2782_s14  ;;  %v216_v33 = vpop.permute.xlu1 %215  ;;  %246 = vrot.lane.b32.xlu0 %v231_v32, %s2782_s14  ;;  %vm488_vm9 = vcmp.lt.s32.totalorder %v3104_v28, 4  ;;  %vm472_vm11 = vcmp.ge.s32.totalorder %v3104_v28, 4 }
 0x1de   :  { %v224_v34 = vsel %vm200_vm2, %v216_v33, 0.0 }
 0x1df   :  { %v232_v35 = vadd.f32 %v224_v34, %v199_v2 }
 0x1e1   :  { %248 = vrot.lane.b32.xlu1 %v232_v35, %s2782_s14 }
 0x1fc   :  { %377 = vadd.xlane.f32.xlu0 %v2953_v15 }
 0x200   :  { %375 = vadd.xlane.f32.xlu0 %v2949_v12 }
 0x205   :  { %379 = vadd.xlane.f32.xlu1 %v2955_v16 }
 0x213   :  { %v3033_v36 = vpop.xlane.xlu0 %365 }
 0x214   :  { %v398_v30 = vrot.slane %v3033_v36, 7 }
 0x243   :  { %v235_v37 = vpop.permute.xlu0 %234 }
 0x244   :  { %v250_v38 = vsel %vm233_vm3, %v235_v37, 0.0 }
 0x245   :  { %v258_v39 = vadd.f32 %v250_v38, %v225_v9 }
 0x247   :  { %v237_v40 = vpop.permute.xlu1 %236  ;;  %267 = vrot.lane.b32.xlu0 %v258_v39, %s2790_s25  ;;  %v239_v41 = vpop.permute.xlu0 %238 }
 0x248   :  { %v251_v15 = vsel %vm233_vm3, %v237_v40, 0.0  ;;  %v252_v12 = vsel %vm233_vm3, %v239_v41, 0.0 }
 0x249   :  { %v259_v16 = vadd.f32 %v251_v15, %v226_v20  ;;  %v260_v42 = vadd.f32 %v252_v12, %v227_v21 }
 0x24b   :  { %269 = vrot.lane.b32.xlu1 %v259_v16, %s2790_s25  ;;  %v241_v43 = vpop.permute.xlu1 %240  ;;  %271 = vrot.lane.b32.xlu0 %v260_v42, %s2790_s25  ;;  %v243_v44 = vpop.permute.xlu0 %242 }
 0x24c   :  { %v253_v45 = vsel %vm233_vm3, %v241_v43, 0.0  ;;  %v254_v46 = vsel %vm233_vm3, %v243_v44, 0.0 }
 0x24d   :  { %v261_v47 = vadd.f32 %v253_v45, %v228_v25  ;;  %v262_v48 = vadd.f32 %v254_v46, %v229_v26 }
 0x24f   :  { %273 = vrot.lane.b32.xlu1 %v261_v47, %s2790_s25  ;;  %v245_v49 = vpop.permute.xlu1 %244  ;;  %275 = vrot.lane.b32.xlu0 %v262_v48, %s2790_s25  ;;  %v247_v50 = vpop.permute.xlu0 %246 }
 0x250   :  { %v255_v51 = vsel %vm233_vm3, %v245_v49, 0.0  ;;  %v256_v52 = vsel %vm233_vm3, %v247_v50, 0.0 }
 0x251   :  { %v263_v53 = vadd.f32 %v255_v51, %v230_v31  ;;  %v264_v54 = vadd.f32 %v256_v52, %v231_v32 }
 0x253   :  { %277 = vrot.lane.b32.xlu1 %v263_v53, %s2790_s25  ;;  %v249_v55 = vpop.permute.xlu1 %248  ;;  %279 = vrot.lane.b32.xlu0 %v264_v54, %s2790_s25 }
 0x254   :  { %v257_v56 = vsel %vm233_vm3, %v249_v55, 0.0 }
 0x255   :  { %v265_v57 = vadd.f32 %v257_v56, %v232_v35 }
 0x257   :  { %281 = vrot.lane.b32.xlu1 %v265_v57, %s2790_s25 }
 0x272   :  { %369 = vadd.xlane.f32.xlu0 %v2937_v6 }
 0x27b   :  { %367 = vadd.xlane.f32.xlu1 %v2941_v7 }
 0x289   :  { %v3054_v58 = vpop.xlane.xlu0 %377 }
 0x28a   :  { %v404_v31 = vrot.slane %v3054_v58, 7 }
 0x28d   :  { %v3056_v59 = vpop.xlane.xlu0 %375 }
 0x292   :  { %v3059_v60 = vpop.xlane.xlu1 %379 }
 0x293   :  { %v405_v29 = vrot.slane %v3059_v60, 7 }
 0x295   :  { %v414_v32 = vsel %vm406_vm5, %v405_v29, %v398_v30 }
 0x2b9   :  { %v268_v61 = vpop.permute.xlu0 %267 }
 0x2ba   :  { %v283_v62 = vsel %vm266_vm4, %v268_v61, 0.0 }
 0x2bb   :  { %v3063_v63 = vadd.f32 %v283_v62, %v258_v39 }
 0x2bd   :  { %v270_v0 = vpop.permute.xlu1 %269  ;;  %300 = vrot.lane.b32.xlu0 %v3063_v63, %s2791_s26  ;;  %v272_v6 = vpop.permute.xlu0 %271 }
 0x2be   :  { %v284_v7 = vsel %vm266_vm4, %v270_v0, 0.0  ;;  %v285_v1 = vsel %vm266_vm4, %v272_v6, 0.0 }
 0x2bf   :  { %v3070_v2 = vadd.f32 %v284_v7, %v259_v16  ;;  %v3072_v3 = vadd.f32 %v285_v1, %v260_v42 }
 0x2c1   :  { %302 = vrot.lane.b32.xlu1 %v3070_v2, %s2791_s26  ;;  %v274_v4 = vpop.permute.xlu1 %273  ;;  %304 = vrot.lane.b32.xlu0 %v3072_v3, %s2791_s26  ;;  %v276_v9 = vpop.permute.xlu0 %275 }
 0x2c2   :  { %v286_v10 = vsel %vm266_vm4, %v274_v4, 0.0  ;;  %v287_v13 = vsel %vm266_vm4, %v276_v9, 0.0 }
 0x2c3   :  { %v3080_v14 = vadd.f32 %v286_v10, %v261_v47  ;;  %v3082_v19 = vadd.f32 %v287_v13, %v262_v48 }
 0x2c5   :  { %306 = vrot.lane.b32.xlu1 %v3080_v14, %s2791_s26  ;;  %v278_v20 = vpop.permute.xlu1 %277  ;;  %308 = vrot.lane.b32.xlu0 %v3082_v19, %s2791_s26  ;;  %v280_v21 = vpop.permute.xlu0 %279 }
 0x2c6   :  { %v288_v5 = vsel %vm266_vm4, %v278_v20, 0.0  ;;  %v289_v22 = vsel %vm266_vm4, %v280_v21, 0.0 }
 0x2c7   :  { %v3090_v23 = vadd.f32 %v288_v5, %v263_v53  ;;  %v3092_v24 = vadd.f32 %v289_v22, %v264_v54 }
 0x2c9   :  { %310 = vrot.lane.b32.xlu1 %v3090_v23, %s2791_s26  ;;  %v282_v25 = vpop.permute.xlu1 %281  ;;  %312 = vrot.lane.b32.xlu0 %v3092_v24, %s2791_s26 }
 0x2ca   :  { %v290_v26 = vsel %vm266_vm4, %v282_v25, 0.0 }
 0x2cb   :  { %v3098_v27 = vadd.f32 %v290_v26, %v265_v57 }
 0x2cd   :  { %314 = vrot.lane.b32.xlu1 %v3098_v27, %s2791_s26 }
 0x2e8   :  { %373 = vadd.xlane.f32.xlu0 %v2947_v11  ;;  %v415_v11 = vsel %vm390_vm6, %v414_v32, 0.0 }
 0x2e9   :  { %v423_v17 = vadd.f32 %v415_v11, %v3033_v36  ;;  %v403_v11 = vrot.slane %v3056_v59, 7 }
 0x2eb   :  { %v439_v35 = vrot.slane %v423_v17, 6 }
 0x2f1   :  { %371 = vadd.xlane.f32.xlu1 %v2943_v8  ;;  %v407_v8 = vsel %vm406_vm5, %v404_v31, %v405_v29 }
 0x2f2   :  { %v3119_v33 = vadd.f32 %v407_v8, %v3059_v60 }
 0x2f4   :  { %v446_v37 = vrot.slane %v3119_v33, 6 }
 0x2f6   :  { %v455_v40 = vsel %vm447_vm7, %v446_v37, %v439_v35 }
 0x2f7   :  { %v456_v16 = vsel %vm431_vm8, %v455_v40, 0.0 }
 0x2f8   :  { %v3145_v46 = vadd.f32 %v456_v16, %v423_v17 }
 0x2fa   :  { %v480_v51 = vrot.slane %v3145_v46, 4 }
 0x2ff   :  { %v3121_v34 = vpop.xlane.xlu0 %369 }
 0x300   :  { %v400_v38 = vrot.slane %v3121_v34, 7 }
 0x308   :  { %v3126_v39 = vpop.xlane.xlu1 %367 }
 0x309   :  { %v399_v41 = vrot.slane %v3126_v39, 7 }
 0x30b   :  { %v413_v15 = vsel %vm406_vm5, %v398_v30, %v399_v41  ;;  %v412_v12 = vsel %vm406_vm5, %v399_v41, %v400_v38 }
 0x30c   :  { %v424_v42 = vadd.f32 %v413_v15, %v3126_v39  ;;  %v3142_v43 = vadd.f32 %v412_v12, %v3121_v34 }
 0x30e   :  { %v440_v44 = vrot.slane %v424_v42, 6  ;;  %v441_v45 = vrot.slane %v3142_v43, 6 }
 0x310   :  { %v454_v47 = vsel %vm447_vm7, %v439_v35, %v440_v44  ;;  %v453_v48 = vsel %vm447_vm7, %v440_v44, %v441_v45 }
 0x311   :  { %v465_v49 = vadd.f32 %v454_v47, %v424_v42  ;;  %v3154_v50 = vadd.f32 %v453_v48, %v3142_v43 }
 0x313   :  { %v481_v52 = vrot.slane %v465_v49, 4  ;;  %v482_v53 = vrot.slane %v3154_v50, 4 }
 0x315   :  { %v495_v54 = vsel %vm488_vm9, %v480_v51, %v481_v52  ;;  %v494_v55 = vsel %vm488_vm9, %v481_v52, %v482_v53 }
 0x316   :  { %v3167_v56 = vadd.f32 %v495_v54, %v465_v49  ;;  %v3170_v57 = vadd.f32 %v494_v55, %v3154_v50 }
 0x318   :  { %v3174_v61 = vadd.f32 %v3170_v57, %v3167_v56 }
 0x32f   :  { %v301_v62 = vpop.permute.xlu0 %300 }
 0x330   :  { %v316_v0 = vsel %vm299_vm10, %v301_v62, 0.0 }
 0x331   :  { %v3180_v6 = vadd.f32 %v316_v0, %v3063_v63 }
 0x333   :  { %v303_v7 = vpop.permute.xlu1 %302  ;;  %333 = vrot.lane.b32.xlu1 %v3180_v6, %s2792_s28  ;;  %v305_v1 = vpop.permute.xlu0 %304 }
 0x334   :  { %v317_v4 = vsel %vm299_vm10, %v303_v7, 0.0  ;;  %v318_v9 = vsel %vm299_vm10, %v305_v1, 0.0 }
 0x335   :  { %v3188_v10 = vadd.f32 %v317_v4, %v3070_v2  ;;  %v3191_v13 = vadd.f32 %v318_v9, %v3072_v3 }
 0x337   :  { %v307_v20 = vpop.permute.xlu1 %306  ;;  %335 = vrot.lane.b32.xlu0 %v3188_v10, %s2792_s28  ;;  %337 = vrot.lane.b32.xlu1 %v3191_v13, %s2792_s28  ;;  %v309_v63 = vpop.permute.xlu0 %308 }
 0x338   :  { %v319_v21 = vsel %vm299_vm10, %v307_v20, 0.0  ;;  %v320_v5 = vsel %vm299_vm10, %v309_v63, 0.0 }
 0x339   :  { %v3200_v22 = vadd.f32 %v319_v21, %v3080_v14  ;;  %v3203_v2 = vadd.f32 %v320_v5, %v3082_v19 }
 0x33b   :  { %v311_v3 = vpop.permute.xlu1 %310  ;;  %339 = vrot.lane.b32.xlu1 %v3200_v22, %s2792_s28  ;;  %341 = vrot.lane.b32.xlu0 %v3203_v2, %s2792_s28  ;;  %v313_v25 = vpop.permute.xlu0 %312 }
 0x33c   :  { %v321_v26 = vsel %vm299_vm10, %v311_v3, 0.0  ;;  %v322_v29 = vsel %vm299_vm10, %v313_v25, 0.0 }
 0x33d   :  { %v3212_v30 = vadd.f32 %v321_v26, %v3090_v23  ;;  %v3215_v14 = vadd.f32 %v322_v29, %v3092_v24  ;;  %v408_v23 = vsel %vm406_vm5, %v403_v11, %v404_v31 }
 0x33e   :  { %v429_v24 = vadd.f32 %v408_v23, %v3054_v58 }
 0x33f   :  { %v315_v19 = vpop.permute.xlu1 %314  ;;  %343 = vrot.lane.b32.xlu1 %v3212_v30, %s2792_s28  ;;  %345 = vrot.lane.b32.xlu0 %v3215_v14, %s2792_s28 }
 0x340   :  { %v323_v32 = vsel %vm299_vm10, %v315_v19, 0.0  ;;  %v445_v17 = vrot.slane %v429_v24, 6 }
 0x341   :  { %v3222_v8 = vadd.f32 %v323_v32, %v3098_v27 }
 0x342   :  { %v448_v27 = vsel %vm447_vm7, %v445_v17, %v446_v37 }
 0x343   :  { %347 = vrot.lane.b32.xlu1 %v3222_v8, %s2792_s28  ;;  %v471_v12 = vadd.f32 %v448_v27, %v3119_v33 }
 0x345   :  { %v487_v44 = vrot.slane %v471_v12, 4 }
 0x347   :  { %v496_v54 = vsel %vm488_vm9, %v487_v44, %v480_v51 }
 0x348   :  { %v497_v7 = vsel %vm472_vm11, %v496_v54, 0.0 }
 0x349   :  { %v505_v25 = vadd.f32 %v497_v7, %v3145_v46 }
 0x34b   :  { %v3282_v46 = vadd.f32 %v3167_v56, %v505_v25 }
 0x375   :  { %v3231_v35 = vpop.xlane.xlu0 %373 }
 0x376   :  { %v402_v40 = vrot.slane %v3231_v35, 7 }
 0x378   :  { %v409_v41 = vsel %vm406_vm5, %v402_v40, %v403_v11 }
 0x379   :  { %v428_v15 = vadd.f32 %v409_v41, %v3056_v59 }
 0x37b   :  { %v444_v31 = vrot.slane %v428_v15, 6 }
 0x37d   :  { %v449_v16 = vsel %vm447_vm7, %v444_v31, %v445_v17 }
 0x37e   :  { %v3244_v42 = vpop.xlane.xlu1 %371  ;;  %v470_v48 = vadd.f32 %v449_v16, %v429_v24 }
 0x37f   :  { %v401_v47 = vrot.slane %v3244_v42, 7 }
 0x380   :  { %v486_v55 = vrot.slane %v470_v48, 4 }
 0x381   :  { %v410_v37 = vsel %vm406_vm5, %v401_v47, %v402_v40  ;;  %v411_v49 = vsel %vm406_vm5, %v400_v38, %v401_v47  ;;  %v585_v47 = vsub.f32 %v505_v25, %v3033_v36 }
 0x382   :  { %v426_v33 = vadd.f32 %v411_v49, %v3244_v42  ;;  %v427_v52 = vadd.f32 %v410_v37, %v3231_v35  ;;  %v489_v51 = vsel %vm488_vm9, %v486_v55, %v487_v44  ;;  %v3307_v37 = vstv %s2452_s29 }
 0x383   :  { %v512_v26 = vadd.f32 %v489_v51, %v471_v12 }
 0x384   :  { %v442_v62 = vrot.slane %v426_v33, 6  ;;  %v443_v0 = vrot.slane %v427_v52, 6 }
 0x386   :  { %v450_v1 = vsel %vm447_vm7, %v443_v0, %v444_v31  ;;  %v451_v38 = vsel %vm447_vm7, %v442_v62, %v443_v0  ;;  %v452_v4 = vsel %vm447_vm7, %v441_v45, %v442_v62 }
 0x387   :  { %v467_v9 = vadd.f32 %v452_v4, %v426_v33  ;;  %v468_v20 = vadd.f32 %v451_v38, %v427_v52  ;;  %v469_v63 = vadd.f32 %v450_v1, %v428_v15  ;;  %v595_v52 = vadd.f32 %v3307_v37, %v585_v47 }
 0x389   :  { %v483_v21 = vrot.slane %v467_v9, 4  ;;  %v484_v5 = vrot.slane %v468_v20, 4  ;;  %v485_v3 = vrot.slane %v469_v63, 4 }
 0x38b   :  { %v490_v29 = vsel %vm488_vm9, %v485_v3, %v486_v55  ;;  %v491_v43 = vsel %vm488_vm9, %v484_v5, %v485_v3  ;;  %v492_v45 = vsel %vm488_vm9, %v483_v21, %v484_v5  ;;  %v493_v19 = vsel %vm488_vm9, %v482_v53, %v483_v21 }
 0x38c   :  { %v508_v32 = vadd.f32 %v493_v19, %v467_v9  ;;  %v509_v11 = vadd.f32 %v492_v45, %v468_v20  ;;  %v510_v23 = vadd.f32 %v491_v43, %v469_v63  ;;  %v511_v24 = vadd.f32 %v490_v29, %v470_v48 }
 0x38d   :  { %v3305_v48 = vadd.f32 %v3174_v61, %v505_v25  ;;  %v586_v55 = vsub.f32 %v3282_v46, %v3126_v39 }
 0x38e   :  { %v532_v17 = vadd.f32 %v508_v32, %v3170_v57  ;;  %v533_v40 = vadd.f32 %v509_v11, %v508_v32  ;;  %v534_v27 = vadd.f32 %v510_v23, %v509_v11  ;;  %v536_v41 = vadd.f32 %v512_v26, %v511_v24 }
 0x38f   :  { %v535_v15 = vadd.f32 %v511_v24, %v510_v23  ;;  %v587_v62 = vsub.f32 %v3305_v48, %v3121_v34  ;;  %v596_v34 = vadd.f32 %v3307_v37, %v586_v55  ;;  %v3340_v24 = vstv %s106_s30 }
 0x390   :  { %v3286_v12 = vadd.f32 %v532_v17, %v3282_v46  ;;  %v3288_v50 = vadd.f32 %v534_v27, %v532_v17  ;;  %v560_v28 = vadd.f32 %v536_v41, %v534_v27  ;;  %v557_v53 = vadd.f32 %v533_v40, %v3174_v61 }
 0x391   :  { %v3291_v31 = vadd.f32 %v535_v15, %v533_v40  ;;  %v597_v4 = vadd.f32 %v3307_v37, %v587_v62  ;;  %v2793_v15 = vmov 683565275   ;;  %v2797_v62 = vmov 920167782  }
 0x392   :  { %v3294_v16 = vadd.f32 %v560_v28, %v3286_v12  ;;  %v588_v56 = vsub.f32 %v3286_v12, %v3244_v42  ;;  %v3298_v57 = vadd.f32 %v557_v53, %v505_v25  ;;  %v4229_v53 = vmov 2475754826  }
 0x3a5   :  { %v334_v49 = vpop.permute.xlu1 %333 }
 0x3a6   :  { %v349_v33 = vsel %vm332_vm12, %v334_v49, 0.0 }
 0x3a7   :  { %v357_v54 = vadd.f32 %v349_v33, %v3180_v6  ;;  %v4234_v33 = vmov 2131351028  }
 0x3a9   :  { %v3317_v36 = vadd.f32 %v595_v52, %v357_v54  ;;  %v338_v61 = vpop.permute.xlu1 %337  ;;  %v336_v0 = vpop.permute.xlu0 %335  ;;  %v2796_v54 = vmov 2102212464  }
 0x3aa   :  { %v351_v7 = vsel %vm332_vm12, %v338_v61, 0.0  ;;  %v350_v1 = vsel %vm332_vm12, %v336_v0, 0.0 }
 0x3ab   :  { %v695_v38 = vand.u32 2147483647, %v3317_v36  ;;  %v698_v6 = vand.u32 2139095040, %v3317_v36  ;;  %v359_v39 = vadd.f32 %v351_v7, %v3191_v13  ;;  %v358_v9 = vadd.f32 %v350_v1, %v3188_v10 }
 0x3ac   :  { %vm697_vm10 = vcmp.lt.s32.totalorder %v3317_v36, 0 }
 0x3ad   :  { %v699_v20 = vshrl.u32 %v698_v6, 23  ;;  %v702_v63 = vand.u32 8388607, %v695_v38  ;;  %v3331_v51 = vadd.f32 %v597_v4, %v359_v39  ;;  %v3333_v21 = vadd.f32 %v596_v34, %v358_v9 }
 0x3ae   :  { %v4232_v39 = vmov 1326507024   ;;  %vm3456_vm11 = vcmp.le.f32.partialorder %v695_v38, 0.7853982 }
 0x3af   :  { %v2453_v5 = vadd.s32 4294967169, %v699_v20  ;;  %v4228_v3 = vand.u32 2147483647, %v3331_v51  ;;  %v904_v25 = vand.u32 2139095040, %v3331_v51  ;;  %v703_v13 = vor.u32 8388608, %v702_v63 }
 0x3b0   :  { %v801_v43 = vand.u32 2139095040, %v3333_v21 }
 0x3b1   :  { %v705_v26 = vadd.s32 1, %v2453_v5  ;;  %v905_v29 = vshrl.u32 %v904_v25, 23  ;;  %v908_v10 = vand.u32 8388607, %v4228_v3  ;;  %v3342_v17 = vshll.u32 %v703_v13, 8 }
 0x3b2   :  { %v802_v32 = vshrl.u32 %v801_v43, 23 }
 0x3b3   :  { %vm706_vm13 = vcmp.gt.s32.totalorder %v705_v26, 0  ;;  %v2461_v19 = vadd.s32 4294967169, %v905_v29  ;;  %v909_v40 = vor.u32 8388608, %v908_v10 }
 0x3b4   :  { %v707_v45 = vsel %vm706_vm13, %v705_v26, 0  ;;  %v2457_v49 = vadd.s32 4294967169, %v802_v32 }
 0x3b5   :  { %v708_v11 = vshrl.u32 %v707_v45, 5  ;;  %v709_v23 = vand.u32 31, %v707_v45  ;;  %v911_v27 = vadd.s32 1, %v2461_v19 }
 0x3b7   :  { %v710_v41 = vsub.s32 32, %v709_v23  ;;  %v712_v28 = vshll.u32 %v2793_v15, %v709_v23  ;;  %v715_v47 = vshll.u32 %v4229_v53, %v709_v23  ;;  %v718_v52 = vshll.u32 %v4234_v33, %v709_v23 }
 0x3b8   :  { %v721_v55 = vshll.u32 %v2796_v54, %v709_v23  ;;  %v724_v61 = vshll.u32 %v2797_v62, %v709_v23  ;;  %vm727_vm14 = vcmp.lt.s32.totalorder %v708_v11, 1  ;;  %vm728_vm15 = vcmp.lt.s32.totalorder %v708_v11, 2 }
 0x3b9   :  { %v713_v0 = vshrl.u32 %v4229_v53, %v710_v41  ;;  %v716_v7 = vshrl.u32 %v4234_v33, %v710_v41  ;;  %v719_v1 = vshrl.u32 %v2796_v54, %v710_v41  ;;  %v711_v6 = vshrl.u32 %v2793_v15, %v710_v41 }
 0x3ba   :  { %v722_v4 = vshrl.u32 %v2797_v62, %v710_v41  ;;  %v725_v34 = vshrl.u32 %v4232_v39, %v710_v41  ;;  %vm729_vm0 = vcmp.lt.s32.totalorder %v708_v11, 3  ;;  %vm912_vm1 = vcmp.gt.s32.totalorder %v911_v27, 0 }
 0x3bb   :  { %v714_v9 = vor.u32 %v713_v0, %v712_v28  ;;  %v717_v20 = vor.u32 %v716_v7, %v715_v47  ;;  %v720_v63 = vor.u32 %v719_v1, %v718_v52  ;;  %vm730_vm2 = vcmp.lt.s32.totalorder %v708_v11, 4 }
 0x3bc   :  { %v723_v5 = vor.u32 %v722_v4, %v721_v55  ;;  %v726_v25 = vor.u32 %v725_v34, %v724_v61  ;;  %v913_v26 = vsel %vm912_vm1, %v911_v27, 0  ;;  %v3366_v61 = vshll.u32 %v909_v40, 8 }
 0x3bd   :  { %v731_v13 = vsel %vm727_vm14, %v711_v6, %v714_v9  ;;  %v732_v29 = vsel %vm730_vm2, %v720_v63, 2102212464  ;;  %v735_v10 = vsel %vm727_vm14, %v714_v9, %v717_v20  ;;  %v739_v43 = vsel %vm727_vm14, %v717_v20, %v720_v63 }
 0x3be   :  { %v733_v45 = vsel %vm729_vm0, %v717_v20, %v732_v29  ;;  %v736_v19 = vsel %vm730_vm2, %v723_v5, 920167782  ;;  %v740_v32 = vsel %vm730_vm2, %v726_v25, 1326507024  ;;  %v3359_v23 = vshrl.u32 %v913_v26, 5 }
 0x3bf   :  { %v734_v41 = vsel %vm728_vm15, %v731_v13, %v733_v45  ;;  %v737_v28 = vsel %vm729_vm0, %v720_v63, %v736_v19  ;;  %v741_v47 = vsel %vm729_vm0, %v723_v5, %v740_v32  ;;  %v915_v27 = vand.u32 31, %v913_v26 }
 0x3c0   :  { %v738_v52 = vsel %vm728_vm15, %v735_v10, %v737_v28  ;;  %v742_v55 = vsel %vm728_vm15, %v739_v43, %v741_v47  ;;  %v4231_v0 = vand.u32 2147483647, %v3333_v21  ;;  %v750_v34 = vmul.u32 %v3342_v17, %v734_v41 }
 0x3c1   :  { %v3370_v7 = vmul.u32.u64.low %v3342_v17, %v742_v55  ;;  %v3371_v1 = vmul.u32.u64.high %v3342_v17, %v742_v55, %v3370_v7  ;;  %v3374_v6 = vmul.u32.u64.low %v3342_v17, %v738_v52  ;;  %v3375_v4 = vmul.u32.u64.high %v3342_v17, %v738_v52, %v3374_v6 }
 0x3c2   :  { %v916_v9 = vsub.s32 32, %v915_v27  ;;  %vm933_vm3 = vcmp.lt.s32.totalorder %v3359_v23, 1  ;;  %v808_v11 = vadd.s32 1, %v2457_v49  ;;  %v918_v40 = vshll.u32 %v2793_v15, %v915_v27 }
 0x3c3   :  { %v921_v20 = vshll.u32 %v4229_v53, %v915_v27  ;;  %v924_v63 = vshll.u32 %v4234_v33, %v915_v27  ;;  %v927_v5 = vshll.u32 %v2796_v54, %v915_v27  ;;  %v930_v17 = vshll.u32 %v2797_v62, %v915_v27 }
 0x3c4   :  { %v919_v25 = vshrl.u32 %v4229_v53, %v916_v9  ;;  %v922_v26 = vshrl.u32 %v4234_v33, %v916_v9  ;;  %v925_v13 = vshrl.u32 %v2796_v54, %v916_v9  ;;  %vm752_vm4 = vc.u32 %v3371_v1, %v3374_v6 }
 0x3c5   :  { %v753_v49 = vadd.s32 1, %v3375_v4  ;;  %v928_v29 = vshrl.u32 %v2797_v62, %v916_v9  ;;  %vm934_vm5 = vcmp.lt.s32.totalorder %v3359_v23, 2  ;;  %v931_v19 = vshrl.u32 %v4232_v39, %v916_v9 }
 0x3c6   :  { %v920_v10 = vor.u32 %v919_v25, %v918_v40  ;;  %v923_v43 = vor.u32 %v922_v26, %v921_v20  ;;  %v926_v45 = vor.u32 %v925_v13, %v924_v63  ;;  %v917_v41 = vshrl.u32 %v2793_v15, %v916_v9  ;;  %v638_v20 = vld [vmem:[#allocation10] sm:$0xff] }
 0x3c7   :  { %v754_v32 = vsel %vm752_vm4, %v753_v49, %v3375_v4  ;;  %v929_v28 = vor.u32 %v928_v29, %v927_v5  ;;  %vm936_vm6 = vcmp.lt.s32.totalorder %v3359_v23, 4  ;;  %v932_v27 = vor.u32 %v931_v19, %v930_v17  ;;  %v671_v4 = vld [vmem:[#allocation11] sm:$0xff]  ;;  %v340_v49 = vpop.permute.xlu1 %339  ;;  %v640_v19 = vld [vmem:[#allocation10 + $0x10] sm:$0xff] }
 0x3c8   :  { %v755_v47 = vadd.s32 %v754_v32, %v750_v34  ;;  %v938_v52 = vsel %vm936_vm6, %v926_v45, 2102212464  ;;  %vm809_vm7 = vcmp.gt.s32.totalorder %v808_v11, 0  ;;  %vm935_vm8 = vcmp.lt.s32.totalorder %v3359_v23, 3  ;;  %v665_v23 = vld [vmem:[#allocation8 + $0x10] sm:$0xff] }
 0x3c9   :  { %v941_v55 = vsel %vm933_vm3, %v920_v10, %v923_v43  ;;  %v942_v7 = vsel %vm936_vm6, %v929_v28, 920167782  ;;  %v945_v40 = vsel %vm933_vm3, %v923_v43, %v926_v45  ;;  %v937_v9 = vsel %vm933_vm3, %v917_v41, %v920_v10 }
 0x3ca   :  { %v756_v63 = vadd.s32 536870912, %v755_v47  ;;  %v943_v5 = vsel %vm935_vm8, %v926_v45, %v942_v7  ;;  %v946_v34 = vsel %vm936_vm6, %v932_v27, 1326507024  ;;  %v939_v25 = vsel %vm935_vm8, %v923_v43, %v938_v52  ;;  %v673_v45 = vld [vmem:[#allocation11 + $0x10] sm:$0xff] }
 0x3cb   :  { %v944_v26 = vsel %vm934_vm5, %v941_v55, %v943_v5  ;;  %v947_v13 = vsel %vm935_vm8, %v929_v28, %v946_v34  ;;  %v810_v17 = vsel %vm809_vm7, %v808_v11, 0  ;;  %v647_v10 = vmul.f32 %v3340_v24, %v638_v20  ;;  %v630_v11 = vld [vmem:[#allocation7] sm:$0xff]  ;;  %v632_v5 = vld [vmem:[#allocation7 + $0x10] sm:$0xff] }
 0x3cc   :  { %v757_v29 = vshrl.u32 %v756_v63, 30  ;;  %v948_v32 = vsel %vm934_vm5, %v945_v40, %v947_v13  ;;  %v3409_v3 = vmul.u32.u64.low %v3366_v61, %v944_v26  ;;  %v3410_v44 = vmul.u32.u64.high %v3366_v61, %v944_v26, %v3409_v3  ;;  %v663_v40 = vld [vmem:[#allocation8] sm:$0xff] }
 0x3cd   :  { %v679_v43 = vmul.f32 %v671_v4, %v3340_v24  ;;  %v3416_v41 = vmul.u32.u64.low %v3366_v61, %v948_v32  ;;  %v3417_v28 = vmul.u32.u64.high %v3366_v61, %v948_v32, %v3416_v41  ;;  %v940_v52 = vsel %vm934_vm5, %v937_v9, %v939_v25 }
 0x3ce   :  { %v758_v27 = vshll.u32 %v757_v29, 30  ;;  %v812_v55 = vand.u32 31, %v810_v17  ;;  %v352_v7 = vsel %vm332_vm12, %v340_v49, 0.0  ;;  %v649_v63 = vmul.f32 %v3340_v24, %v640_v19 }
 0x3cf   :  { %v805_v20 = vand.u32 8388607, %v4231_v0  ;;  %v681_v34 = vmul.f32 %v673_v45, %v3340_v24  ;;  %v959_v26 = vadd.s32 1, %v3410_v44  ;;  %v3430_v13 = vadd.f32 %v647_v10, %v630_v11  ;;  %v342_v45 = vpop.permute.xlu0 %341 }
 0x3d0   :  { %v3426_v4 = vsub.s32 %v755_v47, %v758_v27  ;;  %v956_v9 = vmul.u32 %v3366_v61, %v940_v52  ;;  %vm958_vm9 = vc.u32 %v3417_v28, %v3409_v3  ;;  %v360_v25 = vadd.f32 %v352_v7, %v3200_v22 }
 0x3d1   :  { %v3436_v49 = vadd.f32 %v679_v43, %v663_v40  ;;  %v960_v19 = vsel %vm958_vm9, %v959_v26, %v3410_v44  ;;  %v813_v32 = vsub.s32 32, %v812_v55  ;;  %v3440_v41 = vadd.f32 %v649_v63, %v632_v5 }
 0x3d2   :  { %v761_v47 = vsub.s32 0, %v3426_v4  ;;  %v961_v10 = vadd.s32 %v960_v19, %v956_v9  ;;  %v806_v11 = vor.u32 8388608, %v805_v20  ;;  %v598_v61 = vadd.f32 %v3307_v37, %v588_v56 }
 0x3d3   :  { %v3448_v43 = vadd.f32 %v681_v34, %v665_v23  ;;  %v3452_v44 = vadd.f32 %v3288_v50, %v3282_v46  ;;  %v3464_v12 = vsel %vm332_vm12, %v342_v45, 0.0  ;;  %v751_v56 = vadd.s32 %v3374_v6, %v3371_v1 }
 0x3d4   :  { %v2454_v22 = vmin.u32 %v761_v47, %v3426_v4  ;;  %v962_v52 = vadd.s32 536870912, %v961_v10  ;;  %v3460_v42 = vadd.f32 %v598_v61, %v360_v25  ;;  %v781_v40 = vsub.s32 4, %v757_v29 }
 0x3d5   :  { %v816_v46 = vshrl.u32 %v4229_v53, %v813_v32  ;;  %v811_v38 = vshrl.u32 %v810_v17, 5  ;;  %v822_v63 = vshrl.u32 %v2796_v54, %v813_v32  ;;  %v3472_v20 = vshll.u32 %v806_v11, 8 }
 0x3d6   :  { %v763_v7 = vclz %v2454_v22  ;;  %v3469_v50 = vshrl.u32 %v962_v52, 30  ;;  %v815_v34 = vshll.u32 %v2793_v15, %v812_v55  ;;  %v819_v26 = vshrl.u32 %v4234_v33, %v813_v32 }
 0x3d7   :  { %v825_v23 = vshrl.u32 %v2797_v62, %v813_v32  ;;  %v818_v6 = vshll.u32 %v4229_v53, %v812_v55  ;;  %v821_v9 = vshll.u32 %v4234_v33, %v812_v55  ;;  %v828_v25 = vshrl.u32 %v4232_v39, %v813_v32 }
 0x3d8   :  { %v2455_v5 = vadd.s32 4294967294, %v763_v7  ;;  %v964_v1 = vshll.u32 %v3469_v50, 30  ;;  %v782_v17 = vsel %vm697_vm10, %v781_v40, %v757_v29  ;;  %v817_v47 = vor.u32 %v816_v46, %v815_v34 }
 0x3d9   :  { %v824_v19 = vshll.u32 %v2796_v54, %v812_v55  ;;  %v823_v61 = vor.u32 %v822_v63, %v821_v9  ;;  %v827_v22 = vshll.u32 %v2797_v62, %v812_v55  ;;  %v820_v53 = vor.u32 %v819_v26, %v818_v6 }
 0x3da   :  { %vm2456_vm13 = vcmp.lt.s32.totalorder %v2455_v5, 0  ;;  %v3484_v11 = vsub.s32 %v961_v10, %v964_v1  ;;  %v3489_v39 = vsel %vm3456_vm11, 0, %v782_v17  ;;  %v814_v29 = vshrl.u32 %v2793_v15, %v813_v32 }
 0x3db   :  { %v766_v45 = vsel %vm2456_vm13, 0, %v2455_v5  ;;  %v826_v0 = vor.u32 %v825_v23, %v824_v19  ;;  %v829_v40 = vor.u32 %v828_v25, %v827_v22  ;;  %vm833_vm14 = vcmp.lt.s32.totalorder %v811_v38, 4 }
 0x3dc   :  { %v767_v52 = vsub.s32 32, %v766_v45  ;;  %v771_v7 = vsub.s32 4294967266, %v766_v45  ;;  %v967_v33 = vsub.s32 0, %v3484_v11  ;;  %v768_v46 = vshll.u32 %v3426_v4, %v766_v45 }
 0x3dd   :  { %vm830_vm15 = vcmp.lt.s32.totalorder %v811_v38, 1  ;;  %vm832_vm0 = vcmp.lt.s32.totalorder %v811_v38, 3  ;;  %v835_v63 = vsel %vm833_vm14, %v823_v61, 2102212464  ;;  %v839_v1 = vsel %vm833_vm14, %v826_v0, 920167782 }
 0x3de   :  { %v769_v10 = vshrl.u32 %v751_v56, %v767_v52  ;;  %v772_v5 = vadd.s32 127, %v771_v7  ;;  %v2462_v55 = vmin.u32 %v967_v33, %v3484_v11  ;;  %v838_v23 = vsel %vm830_vm15, %v817_v47, %v820_v53 }
 0x3df   :  { %vm903_vm1 = vcmp.lt.s32.totalorder %v3331_v51, 0  ;;  %v840_v32 = vsel %vm832_vm0, %v823_v61, %v839_v1  ;;  %v842_v9 = vsel %vm830_vm15, %v820_v53, %v823_v61  ;;  %v843_v25 = vsel %vm833_vm14, %v829_v40, 1326507024 }
 0x3e0   :  { %v770_v34 = vor.u32 %v769_v10, %v768_v46  ;;  %v773_v26 = vshll.u32 %v772_v5, 23  ;;  %v969_v6 = vclz %v2462_v55  ;;  %vm831_vm2 = vcmp.lt.s32.totalorder %v811_v38, 2 }
 0x3e1   :  { %v834_v56 = vsel %vm830_vm15, %v814_v29, %v817_v47  ;;  %v836_v17 = vsel %vm832_vm0, %v820_v53, %v835_v63  ;;  %v841_v45 = vsel %vm831_vm2, %v838_v23, %v840_v32  ;;  %v844_v22 = vsel %vm832_vm0, %v826_v0, %v843_v25 }
 0x3e2   :  { %v774_v4 = vor.u32 4788187, %v773_v26  ;;  %v777_v33 = vcvt.s32.f32 %v770_v34  ;;  %v2463_v19 = vadd.s32 4294967294, %v969_v6  ;;  %v845_v7 = vsel %vm831_vm2, %v842_v9, %v844_v22 }
 0x3e3   :  { %v3500_v46 = vmul.u32.u64.low %v3472_v20, %v841_v45  ;;  %v3501_v10 = vmul.u32.u64.high %v3472_v20, %v841_v45, %v3500_v46  ;;  %v837_v61 = vsel %vm831_vm2, %v834_v56, %v836_v17  ;;  %v987_v29 = vsub.s32 4, %v3469_v50 }
 0x3e4   :  { %v775_v52 = vand.u32 2147483647, %v774_v4  ;;  %vm2464_vm3 = vcmp.lt.s32.totalorder %v2463_v19, 0  ;;  %v3505_v40 = vmul.u32.u64.low %v3472_v20, %v845_v7  ;;  %v3506_v5 = vmul.u32.u64.high %v3472_v20, %v845_v7, %v3505_v40 }
 0x3e5   :  { %v972_v53 = vsel %vm2464_vm3, 0, %v2463_v19  ;;  %v1004_v38 = vand.u32 2147483647, %v3460_v42  ;;  %v957_v0 = vadd.s32 %v3409_v3, %v3417_v28  ;;  %v1007_v34 = vand.u32 2139095040, %v3460_v42 }
 0x3e6   :  { %v778_v47 = vmul.f32 %v777_v33, %v775_v52  ;;  %v973_v55 = vsub.s32 32, %v972_v53  ;;  %v977_v63 = vsub.s32 4294967266, %v972_v53  ;;  %v1612_v23 = vadd.s32 3, %v3489_v39 }
 0x3e7   :  { %v853_v1 = vmul.u32 %v3472_v20, %v837_v61  ;;  %v856_v6 = vadd.s32 1, %v3501_v10  ;;  %v974_v32 = vshll.u32 %v3484_v11, %v972_v53  ;;  %vm855_vm4 = vc.u32 %v3506_v5, %v3500_v46 }
 0x3e8   :  { %v779_v26 = vxor.u32 2147483648, %v778_v47  ;;  %v975_v9 = vshrl.u32 %v957_v0, %v973_v55  ;;  %v978_v25 = vadd.s32 127, %v977_v63  ;;  %v988_v28 = vsel %vm903_vm1, %v987_v29, %v3469_v50 }
 0x3e9   :  { %v857_v4 = vsel %vm855_vm4, %v856_v6, %v3501_v10  ;;  %v1008_v56 = vshrl.u32 %v1007_v34, 23  ;;  %v4238_v45 = vsub.f32 %v3298_v57, %v3231_v35  ;;  %v361_v50 = vadd.f32 %v3464_v12, %v3203_v2 }
 0x3ea   :  { %v780_v3 = vsel %vm697_vm10, %v779_v26, %v778_v47  ;;  %v976_v11 = vor.u32 %v975_v9, %v974_v32  ;;  %v979_v17 = vshll.u32 %v978_v25, 23  ;;  %v858_v33 = vadd.s32 %v857_v4, %v853_v1 }
 0x3eb   :  { %v783_v20 = vsel %vm3456_vm11, %v3317_v36, %v780_v3  ;;  %v2465_v19 = vadd.s32 4294967169, %v1008_v56  ;;  %v599_v22 = vadd.f32 %v3307_v37, %v4238_v45  ;;  %v4239_v52 = vand.u32 2147483647, %v3331_v51 }
 0x3ec   :  { %2571 = vcosq.f32 %v783_v20  ;;  %v980_v27 = vor.u32 4788187, %v979_v17  ;;  %v859_v10 = vadd.s32 536870912, %v858_v33  ;;  %v788_v61 = vand.u32 3, %v3489_v39 }
 0x3ed   :  { %2573 = vsinq.f32 %v783_v20  ;;  %vm3536_vm5 = vcmp.le.f32.partialorder %v4239_v52, 0.7853982  ;;  %v1011_v35 = vand.u32 8388607, %v1004_v38  ;;  %v1014_v57 = vadd.s32 1, %v2465_v19 }
 0x3ee   :  { %v990_v40 = vsel %vm3536_vm5, 0, %v988_v28  ;;  %v1613_v47 = vand.u32 3, %v1612_v23  ;;  %v981_v2 = vand.u32 2147483647, %v980_v27  ;;  %v983_v12 = vcvt.s32.f32 %v976_v11 }
 0x3ef   :  { %v860_v53 = vshrl.u32 %v859_v10, 30  ;;  %v4242_v29 = vand.u32 2147483647, %v3333_v21  ;;  %vm800_vm7 = vcmp.lt.s32.totalorder %v3333_v21, 0  ;;  %vm1015_vm8 = vcmp.gt.s32.totalorder %v1014_v57, 0 }
 0x3f0   :  { %v3552_v39 = vadd.f32 %v599_v22, %v361_v50  ;;  %v984_v55 = vmul.f32 %v983_v12, %v981_v2  ;;  %v1820_v63 = vadd.s32 3, %v990_v40  ;;  %v1016_v26 = vsel %vm1015_vm8, %v1014_v57, 0 }
 0x3f1   :  { %vm3547_vm6 = vcmp.le.f32.partialorder %v4242_v29, 0.7853982  ;;  %v861_v34 = vshll.u32 %v860_v53, 30  ;;  %vm789_vm9 = vcmp.lt.s32.totalorder %v788_v61, 2  ;;  %vm790_vm10 = vcmp.eq.s32.totalorder %v788_v61, 0 }
 0x3f2   :  { %v884_v23 = vsub.s32 4, %v860_v53  ;;  %v1012_v1 = vor.u32 8388608, %v1011_v35  ;;  %v3554_v6 = vand.u32 31, %v1016_v26  ;;  %vm787_vm11 = vweird.f32 %v3317_v36 }
 0x3f3   :  { %vm793_vm13 = vcmp.eq.s32.totalorder %v788_v61, 2  ;;  %vm1614_vm14 = vcmp.lt.s32.totalorder %v1613_v47, 2  ;;  %v985_v32 = vxor.u32 2147483648, %v984_v55  ;;  %v3557_v9 = vsub.s32 %v858_v33, %v861_v34 }
 0x3f4   :  { %vm1615_vm15 = vcmp.eq.s32.totalorder %v1613_v47, 0  ;;  %vm1618_vm0 = vcmp.eq.s32.totalorder %v1613_v47, 2  ;;  %v3559_v25 = vand.u32 3, %v990_v40  ;;  %v1110_v3 = vand.u32 2139095040, %v3552_v39 }
 0x3f5   :  { %v986_v28 = vsel %vm903_vm1, %v985_v32, %v984_v55  ;;  %v3564_v4 = vand.u32 3, %v1820_v63  ;;  %v3568_v56 = vadd.s32 %v3500_v46, %v3506_v5  ;;  %v864_v20 = vsub.s32 0, %v3557_v9 }
 0x3f6   :  { %v2572_v11 = vpop.eup %2571  ;;  %v989_v17 = vsel %vm3536_vm5, %v3331_v51, %v986_v28  ;;  %v885_v33 = vsel %vm800_vm7, %v884_v23, %v860_v53  ;;  %v1019_v19 = vsub.s32 32, %v3554_v6  ;;  %v3577_v45 = vshll.u32 %v1012_v1, 8 }
 0x3f7   :  { %v2574_v22 = vpop.eup %2573  ;;  %v794_v50 = vxor.u32 2147483648, %v2572_v11  ;;  %2575 = vcosq.f32 %v989_v17  ;;  %v2458_v46 = vmin.u32 %v864_v20, %v3557_v9  ;;  %v1107_v5 = vand.u32 2147483647, %v3552_v39 }
 0x3f8   :  { %v791_v52 = vxor.u32 2147483648, %v2574_v22  ;;  %2577 = vsinq.f32 %v989_v17  ;;  %v3581_v27 = vshrl.u32 %v1016_v26, 5  ;;  %v3583_v7 = vshrl.u32 %v1110_v3, 23 }
 0x3f9   :  { %v795_v10 = vsel %vm793_vm13, %v794_v50, %v2574_v22  ;;  %v1620_v40 = vsel %vm1618_vm0, %v794_v50, %v2574_v22  ;;  %v866_v35 = vclz %v2458_v46  ;;  %v3589_v57 = vsel %vm3547_vm6, 0, %v885_v33 }
 0x3fa   :  { %v792_v2 = vsel %vm790_vm10, %v2572_v11, %v791_v52  ;;  %v1617_v12 = vsel %vm1615_vm15, %v2572_v11, %v791_v52  ;;  %v1021_v53 = vshll.u32 %v2793_v15, %v3554_v6  ;;  %v4245_v29 = vmov 2475754826  }
 0x3fb   :  { %v1022_v55 = vshrl.u32 %v4245_v29, %v1019_v19  ;;  %v796_v63 = vsel %vm789_vm9, %v792_v2, %v795_v10  ;;  %v1621_v34 = vsel %vm1614_vm14, %v1617_v12, %v1620_v40  ;;  %vm999_vm1 = vcmp.eq.s32.totalorder %v3559_v25, 2 }
 0x3fc   :  { %vm1826_vm2 = vcmp.eq.s32.totalorder %v3564_v4, 2  ;;  %v2459_v26 = vadd.s32 4294967294, %v866_v35  ;;  %v1024_v23 = vshll.u32 %v4245_v29, %v3554_v6  ;;  %v797_v1 = vsel %vm787_vm11, nan, %v796_v63 }
 0x3fd   :  { %v1622_v32 = vsel %vm787_vm11, nan, %v1621_v34  ;;  %vm996_vm3 = vcmp.eq.s32.totalorder %v3559_v25, 0  ;;  %vm1823_vm4 = vcmp.eq.s32.totalorder %v3564_v4, 0  ;;  %v1020_v61 = vshrl.u32 %v2793_v15, %v1019_v19 }
 0x3fe   :  { %v4246_v47 = vmov 2131351028   ;;  %v2351_v28 = vmul.f32 %v797_v1, %v3430_v13  ;;  %v2359_v20 = vmul.f32 %v1622_v32, %v3436_v49  ;;  %v2383_v11 = vmul.f32 %v1622_v32, %v3430_v13 }
 0x3ff   :  { %v1025_v3 = vshrl.u32 %v4246_v47, %v1019_v19  ;;  %v2391_v17 = vmul.f32 %v797_v1, %v3436_v49  ;;  %vm995_vm5 = vcmp.lt.s32.totalorder %v3559_v25, 2  ;;  %vm1822_vm8 = vcmp.lt.s32.totalorder %v3564_v4, 2 }
 0x400   :  { %vm993_vm9 = vweird.f32 %v3331_v51  ;;  %vm2460_vm10 = vcmp.lt.s32.totalorder %v2459_v26, 0  ;;  %v1023_v36 = vor.u32 %v1022_v55, %v1021_v53  ;;  %v1027_v33 = vshll.u32 %v4246_v47, %v3554_v6 }
 0x401   :  { %v1028_v22 = vshrl.u32 %v2796_v54, %v1019_v19  ;;  %v2367_v50 = vsub.f32 %v2351_v28, %v2359_v20  ;;  %v2399_v46 = vadd.f32 %v2391_v17, %v2383_v11  ;;  %v869_v52 = vsel %vm2460_vm10, 0, %v2459_v26  ;;  %v2576_v2 = vpop.eup %2575 }
 0x402   :  { %v1031_v13 = vshrl.u32 %v2797_v62, %v1019_v19  ;;  %v870_v10 = vsub.s32 32, %v869_v52  ;;  %v874_v49 = vsub.s32 4294967266, %v869_v52  ;;  %v1026_v40 = vor.u32 %v1025_v3, %v1024_v23  ;;  %v2578_v26 = vpop.eup %2577 }
 0x403   :  { %v1030_v35 = vshll.u32 %v2796_v54, %v3554_v6  ;;  %2375 = vst [vmem:[#allocation14] sm:$0xff] %v2367_v50  ;;  %2407 = vst [vmem:[#allocation15] sm:$0xff] %v2399_v46  ;;  %v871_v12 = vshll.u32 %v3557_v9, %v869_v52  ;;  %v1029_v53 = vor.u32 %v1028_v22, %v1027_v33  ;;  %v4247_v63 = vmov 1326507024  }
 0x404   :  { %v1033_v55 = vshll.u32 %v2797_v62, %v3554_v6  ;;  %v1034_v34 = vshrl.u32 %v4247_v63, %v1019_v19  ;;  %v1000_v1 = vxor.u32 2147483648, %v2576_v2  ;;  %v872_v32 = vshrl.u32 %v3568_v56, %v870_v10 }
 0x405   :  { %v875_v28 = vadd.s32 127, %v874_v49  ;;  %v1032_v23 = vor.u32 %v1031_v13, %v1030_v35  ;;  %v997_v3 = vxor.u32 2147483648, %v2578_v26  ;;  %vm1036_vm11 = vcmp.lt.s32.totalorder %v3581_v27, 1 }
 0x406   :  { %v1035_v20 = vor.u32 %v1034_v34, %v1033_v55  ;;  %vm1037_vm13 = vcmp.lt.s32.totalorder %v3581_v27, 2  ;;  %v1001_v9 = vsel %vm999_vm1, %v1000_v1, %v2578_v26  ;;  %v1828_v6 = vsel %vm1826_vm2, %v1000_v1, %v2578_v26 }
 0x407   :  { %v876_v11 = vshll.u32 %v875_v28, 23  ;;  %vm1038_vm14 = vcmp.lt.s32.totalorder %v3581_v27, 3  ;;  %v998_v56 = vsel %vm996_vm3, %v2576_v2, %v997_v3  ;;  %v1825_v19 = vsel %vm1823_vm4, %v2576_v2, %v997_v3 }
 0x408   :  { %v873_v17 = vor.u32 %v872_v32, %v871_v12  ;;  %vm1039_vm15 = vcmp.lt.s32.totalorder %v3581_v27, 4  ;;  %v1002_v33 = vsel %vm995_vm5, %v998_v56, %v1001_v9  ;;  %v1829_v22 = vsel %vm1822_vm8, %v1825_v19, %v1828_v6  ;;  %v639_v32 = vld [vmem:[#allocation10 + $0x8] sm:$0xff] }
 0x409   :  { %v877_v50 = vor.u32 4788187, %v876_v11  ;;  %v1040_v46 = vsel %vm1036_vm11, %v1020_v61, %v1023_v36  ;;  %v1003_v52 = vsel %vm993_vm9, nan, %v1002_v33  ;;  %v1830_v13 = vsel %vm993_vm9, nan, %v1829_v22 }
 0x40a   :  { %v1041_v10 = vsel %vm1039_vm15, %v1029_v53, 2102212464  ;;  %v1044_v25 = vsel %vm1036_vm11, %v1023_v36, %v1026_v40  ;;  %v2353_v49 = vmul.f32 %v1003_v52, %v3440_v41  ;;  %v2361_v4 = vmul.f32 %v1830_v13, %v3448_v43 }
 0x40b   :  { %v2385_v35 = vmul.f32 %v1830_v13, %v3440_v41  ;;  %v2393_v61 = vmul.f32 %v1003_v52, %v3448_v43  ;;  %v878_v2 = vand.u32 2147483647, %v877_v50  ;;  %v880_v12 = vcvt.s32.f32 %v873_v17  ;;  %v672_v41 = vld [vmem:[#allocation11 + $0x8] sm:$0xff] }
 0x40c   :  { %v1045_v51 = vsel %vm1039_vm15, %v1032_v23, 920167782  ;;  %v1048_v55 = vsel %vm1036_vm11, %v1026_v40, %v1029_v53  ;;  %v2369_v34 = vsub.f32 %v2353_v49, %v2361_v4  ;;  %v1049_v1 = vsel %vm1039_vm15, %v1035_v20, 1326507024  ;;  %v664_v49 = vld [vmem:[#allocation8 + $0x8] sm:$0xff] }
 0x40d   :  { %v2401_v26 = vadd.f32 %v2393_v61, %v2385_v35  ;;  %v1046_v36 = vsel %vm1038_vm14, %v1029_v53, %v1045_v51  ;;  %v881_v28 = vmul.f32 %v880_v12, %v878_v2  ;;  %v1042_v43 = vsel %vm1038_vm14, %v1026_v40, %v1041_v10 }
 0x40e   :  { %v1047_v3 = vsel %vm1037_vm13, %v1044_v25, %v1046_v36  ;;  %v1050_v9 = vsel %vm1038_vm14, %v1032_v23, %v1049_v1  ;;  %2377 = vst [vmem:[#allocation14 + $0x10] sm:$0xff] %v2369_v34  ;;  %v2469_v11 = vadd.s32 4294967169, %v3583_v7  ;;  %v648_v17 = vmul.f32 %v3340_v24, %v639_v32  ;;  %v344_v34 = vpop.permute.xlu1 %343 }
 0x40f   :  { %2409 = vst [vmem:[#allocation15 + $0x10] sm:$0xff] %v2401_v26  ;;  %v1051_v53 = vsel %vm1037_vm13, %v1048_v55, %v1050_v9  ;;  %v3675_v6 = vmul.u32.u64.low %v3577_v45, %v1047_v3  ;;  %v3676_v20 = vmul.u32.u64.high %v3577_v45, %v1047_v3, %v3675_v6  ;;  %v882_v56 = vxor.u32 2147483648, %v881_v28 }
 0x410   :  { %v3681_v40 = vmul.u32.u64.low %v3577_v45, %v1051_v53  ;;  %v3682_v19 = vmul.u32.u64.high %v3577_v45, %v1051_v53, %v3681_v40  ;;  %v680_v23 = vmul.f32 %v672_v41, %v3340_v24  ;;  %v1043_v33 = vsel %vm1037_vm13, %v1040_v46, %v1042_v43  ;;  %v631_v46 = vld [vmem:[#allocation7 + $0x8] sm:$0xff] }
 0x411   :  { %v1117_v22 = vadd.s32 1, %v2469_v11  ;;  %v883_v50 = vsel %vm800_vm7, %v882_v56, %v881_v28  ;;  %v1716_v52 = vadd.s32 3, %v3589_v57  ;;  %v1114_v7 = vand.u32 8388607, %v1107_v5 }
 0x412   :  { %v590_v13 = vsub.f32 %v3452_v44, %v3056_v59  ;;  %v886_v10 = vsel %vm3547_vm6, %v3333_v21, %v883_v50  ;;  %v3699_v25 = vand.u32 3, %v3589_v57  ;;  %v1062_v27 = vadd.s32 1, %v3676_v20 }
 0x413   :  { %vm1118_vm0 = vcmp.gt.s32.totalorder %v1117_v22, 0  ;;  %2579 = vcosq.f32 %v886_v10  ;;  %v1059_v4 = vmul.u32 %v3577_v45, %v1043_v33  ;;  %vm1061_vm7 = vc.u32 %v3682_v19, %v3675_v6 }
 0x414   :  { %v1119_v35 = vsel %vm1118_vm0, %v1117_v22, 0  ;;  %2581 = vsinq.f32 %v886_v10  ;;  %v1063_v59 = vsel %vm1061_vm7, %v1062_v27, %v3676_v20  ;;  %v1717_v0 = vand.u32 3, %v1716_v52 }
 0x415   :  { %v1121_v44 = vand.u32 31, %v1119_v35  ;;  %v1064_v61 = vadd.s32 %v1063_v59, %v1059_v4  ;;  %v3706_v57 = vadd.f32 %v648_v17, %v631_v46  ;;  %v3708_v2 = vadd.f32 %v680_v23, %v664_v49 }
 0x416   :  { %v3712_v51 = vadd.f32 %v3291_v31, %v3305_v48  ;;  %vm896_vm6 = vcmp.eq.s32.totalorder %v3699_v25, 2  ;;  %v1115_v55 = vor.u32 8388608, %v1114_v7  ;;  %v3716_v26 = vadd.f32 %v3307_v37, %v590_v13 }
 0x417   :  { %v1122_v12 = vsub.s32 32, %v1121_v44  ;;  %v1065_v45 = vadd.s32 536870912, %v1064_v61  ;;  %vm893_vm1 = vcmp.eq.s32.totalorder %v3699_v25, 0  ;;  %v3719_v36 = vshrl.u32 %v1119_v35, 5 }
 0x418   :  { %vm892_vm2 = vcmp.lt.s32.totalorder %v3699_v25, 2  ;;  %vm1718_vm3 = vcmp.lt.s32.totalorder %v1717_v0, 2  ;;  %v1133_v48 = vshll.u32 %v2796_v54, %v1121_v44  ;;  %vm890_vm4 = vweird.f32 %v3333_v21 }
 0x419   :  { %v1125_v1 = vshrl.u32 %v4245_v29, %v1122_v12  ;;  %v1128_v32 = vshrl.u32 %v4246_v47, %v1122_v12  ;;  %v1131_v41 = vshrl.u32 %v2796_v54, %v1122_v12  ;;  %v3725_v31 = vshrl.u32 %v1065_v45, 30 }
 0x41a   :  { %v1134_v28 = vshrl.u32 %v2797_v62, %v1122_v12  ;;  %v1124_v43 = vshll.u32 %v2793_v15, %v1121_v44  ;;  %v1127_v3 = vshll.u32 %v4245_v29, %v1121_v44  ;;  %v1130_v9 = vshll.u32 %v4246_v47, %v1121_v44 }
 0x41b   :  { %v354_v53 = vsel %vm332_vm12, %v344_v34, 0.0  ;;  %vm1719_vm5 = vcmp.eq.s32.totalorder %v1717_v0, 0  ;;  %vm1722_vm8 = vcmp.eq.s32.totalorder %v1717_v0, 2  ;;  %v1067_v20 = vshll.u32 %v3725_v31, 30 }
 0x41c   :  { %v1135_v11 = vor.u32 %v1134_v28, %v1133_v48  ;;  %v1126_v56 = vor.u32 %v1125_v1, %v1124_v43  ;;  %v1129_v40 = vor.u32 %v1128_v32, %v1127_v3  ;;  %v1132_v17 = vor.u32 %v1131_v41, %v1130_v9 }
 0x41d   :  { %vm1142_vm9 = vcmp.lt.s32.totalorder %v3719_v36, 4  ;;  %v2580_v23 = vpop.eup %2579  ;;  %v3737_v33 = vsub.s32 %v1064_v61, %v1067_v20  ;;  %v3741_v50 = vshll.u32 %v1115_v55, 8  ;;  %v362_v52 = vadd.f32 %v354_v53, %v3212_v30 }
 0x41e   :  { %v1148_v22 = vsel %vm1142_vm9, %v1135_v11, 920167782  ;;  %v2582_v7 = vpop.eup %2581  ;;  %v897_v13 = vxor.u32 2147483648, %v2580_v23  ;;  %v1136_v10 = vshll.u32 %v2797_v62, %v1121_v44  ;;  %v1137_v27 = vshrl.u32 %v4247_v63, %v1122_v12 }
 0x41f   :  { %vm1139_vm10 = vcmp.lt.s32.totalorder %v3719_v36, 1  ;;  %v894_v46 = vxor.u32 2147483648, %v2582_v7  ;;  %v1070_v49 = vsub.s32 0, %v3737_v33  ;;  %v1123_v4 = vshrl.u32 %v2793_v15, %v1122_v12 }
 0x420   :  { %vm1141_vm11 = vcmp.lt.s32.totalorder %v3719_v36, 3  ;;  %v898_v35 = vsel %vm896_vm6, %v897_v13, %v2582_v7  ;;  %v1724_v30 = vsel %vm1722_vm8, %v897_v13, %v2582_v7  ;;  %v1147_v59 = vsel %vm1139_vm10, %v1126_v56, %v1129_v40 }
 0x421   :  { %v1149_v44 = vsel %vm1141_vm11, %v1132_v17, %v1148_v22  ;;  %v895_v61 = vsel %vm893_vm1, %v2580_v23, %v894_v46  ;;  %v1721_v45 = vsel %vm1719_vm5, %v2580_v23, %v894_v46  ;;  %v2466_v12 = vmin.u32 %v1070_v49, %v3737_v33  ;;  %v346_v22 = vpop.permute.xlu0 %345 }
 0x422   :  { %vm1140_vm13 = vcmp.lt.s32.totalorder %v3719_v36, 2  ;;  %v899_v55 = vsel %vm892_vm2, %v895_v61, %v898_v35  ;;  %v1725_v34 = vsel %vm1718_vm3, %v1721_v45, %v1724_v30  ;;  %v1138_v1 = vor.u32 %v1137_v27, %v1136_v10 }
 0x423   :  { %v1144_v32 = vsel %vm1142_vm9, %v1132_v17, 2102212464  ;;  %v900_v41 = vsel %vm890_vm4, nan, %v899_v55  ;;  %v1726_v48 = vsel %vm890_vm4, nan, %v1725_v34  ;;  %vm1006_vm14 = vcmp.lt.s32.totalorder %v3460_v42, 0  ;;  %v674_v34 = vld [vmem:[#allocation11 + $0x18] sm:$0xff] }
 0x424   :  { %v1072_v28 = vclz %v2466_v12  ;;  %v1150_v43 = vsel %vm1140_vm13, %v1147_v59, %v1149_v44  ;;  %v2352_v25 = vmul.f32 %v900_v41, %v3706_v57  ;;  %v2360_v0 = vmul.f32 %v1726_v48, %v3708_v2 }
 0x425   :  { %v2384_v3 = vmul.f32 %v1726_v48, %v3706_v57  ;;  %v2392_v9 = vmul.f32 %v900_v41, %v3708_v2  ;;  %v1143_v20 = vsel %vm1139_vm10, %v1123_v4, %v1126_v56  ;;  %v1151_v21 = vsel %vm1139_vm10, %v1129_v40, %v1132_v17 }
 0x426   :  { %v2467_v53 = vadd.s32 4294967294, %v1072_v28  ;;  %v3783_v23 = vadd.f32 %v3716_v26, %v362_v52  ;;  %v2368_v7 = vsub.f32 %v2352_v25, %v2360_v0  ;;  %v1145_v10 = vsel %vm1141_vm11, %v1129_v40, %v1144_v32 }
 0x427   :  { %v2400_v13 = vadd.f32 %v2392_v9, %v2384_v3  ;;  %v1152_v57 = vsel %vm1142_vm9, %v1138_v1, 1326507024  ;;  %v3792_v56 = vmul.u32.u64.low %v3741_v50, %v1150_v43  ;;  %v3793_v27 = vmul.u32.u64.high %v3741_v50, %v1150_v43, %v3792_v56  ;;  %v666_v9 = vld [vmem:[#allocation8 + $0x18] sm:$0xff] }
 0x428   :  { %vm2468_vm15 = vcmp.lt.s32.totalorder %v2467_v53, 0  ;;  %v1153_v2 = vsel %vm1141_vm11, %v1135_v11, %v1152_v57  ;;  %2376 = vst [vmem:[#allocation14 + $0x8] sm:$0xff] %v2368_v7  ;;  %v1090_v17 = vsub.s32 4, %v3725_v31  ;;  %v355_v52 = vsel %vm332_vm12, %v346_v22, 0.0  ;;  %v642_v22 = vld [vmem:[#allocation10 + $0x20] sm:$0xff] }
 0x429   :  { %2408 = vst [vmem:[#allocation15 + $0x8] sm:$0xff] %v2400_v13  ;;  %v1075_v26 = vsel %vm2468_vm15, 0, %v2467_v53  ;;  %v1154_v40 = vsel %vm1140_vm13, %v1151_v21, %v1153_v2  ;;  %v1060_v46 = vadd.s32 %v3675_v6, %v3682_v19  ;;  %v1213_v4 = vand.u32 2139095040, %v3783_v23 }
 0x42a   :  { %v1076_v11 = vsub.s32 32, %v1075_v26  ;;  %v1080_v49 = vsub.s32 4294967266, %v1075_v26  ;;  %v1077_v35 = vshll.u32 %v3737_v33, %v1075_v26  ;;  %v1146_v30 = vsel %vm1140_vm13, %v1143_v20, %v1145_v10  ;;  %v641_v33 = vld [vmem:[#allocation10 + $0x18] sm:$0xff] }
 0x42b   :  { %v3808_v59 = vmul.u32.u64.low %v3741_v50, %v1154_v40  ;;  %v3809_v44 = vmul.u32.u64.high %v3741_v50, %v1154_v40, %v3808_v59  ;;  %v1165_v12 = vadd.s32 1, %v3793_v27  ;;  %v1214_v55 = vshrl.u32 %v1213_v4, 23 }
 0x42c   :  { %v1078_v61 = vshrl.u32 %v1060_v46, %v1076_v11  ;;  %v1081_v45 = vadd.s32 127, %v1080_v49  ;;  %v1091_v6 = vsel %vm1006_vm14, %v1090_v17, %v3725_v31  ;;  %v591_v19 = vsub.f32 %v3712_v51, %v3054_v58 }
 0x42d   :  { %vm3819_vm0 = vcmp.le.f32.partialorder %v1004_v38, 0.7853982  ;;  %v2473_v41 = vadd.s32 4294967169, %v1214_v55  ;;  %v1162_v48 = vmul.u32 %v3741_v50, %v1146_v30  ;;  %vm1164_vm7 = vc.u32 %v3809_v44, %v3792_v56  ;;  %v633_v50 = vld [vmem:[#allocation7 + $0x18] sm:$0xff] }
 0x42e   :  { %v1079_v1 = vor.u32 %v1078_v61, %v1077_v35  ;;  %v1082_v32 = vshll.u32 %v1081_v45, 23  ;;  %v1210_v31 = vand.u32 2147483647, %v3783_v23  ;;  %v363_v58 = vadd.f32 %v355_v52, %v3215_v14 }
 0x42f   :  { %v1093_v28 = vsel %vm3819_vm0, 0, %v1091_v6  ;;  %v1166_v38 = vsel %vm1164_vm7, %v1165_v12, %v3793_v27  ;;  %v1220_v43 = vadd.s32 1, %v2473_v41  ;;  %v650_v25 = vmul.f32 %v3340_v24, %v641_v33 }
 0x430   :  { %v1083_v51 = vor.u32 4788187, %v1082_v32  ;;  %v682_v0 = vmul.f32 %v674_v34, %v3340_v24  ;;  %v1167_v3 = vadd.s32 %v1166_v38, %v1162_v48  ;;  %v1086_v20 = vcvt.s32.f32 %v1079_v1 }
 0x431   :  { %vm1221_vm6 = vcmp.gt.s32.totalorder %v1220_v43, 0  ;;  %v601_v21 = vadd.f32 %v3307_v37, %v591_v19  ;;  %v1924_v14 = vadd.s32 3, %v1093_v28  ;;  %v1217_v13 = vand.u32 8388607, %v1210_v31 }
 0x432   :  { %v1084_v53 = vand.u32 2147483647, %v1083_v51  ;;  %v1168_v7 = vadd.s32 536870912, %v1167_v3  ;;  %v1222_v10 = vsel %vm1221_vm6, %v1220_v43, 0  ;;  %v3838_v26 = vadd.f32 %v650_v25, %v633_v50 }
 0x433   :  { %v1224_v2 = vand.u32 31, %v1222_v10  ;;  %v3836_v27 = vadd.f32 %v601_v21, %v363_v58  ;;  %v3840_v17 = vadd.f32 %v682_v0, %v666_v9  ;;  %v3845_v46 = vmul.f32 %v3340_v24, %v642_v22 }
 0x434   :  { %v1087_v57 = vmul.f32 %v1086_v20, %v1084_v53  ;;  %v3842_v40 = vshrl.u32 %v1168_v7, 30  ;;  %v592_v49 = vsub.f32 %v3294_v16, %v3059_v60  ;;  %v3849_v4 = vand.u32 3, %v1093_v28 }
 0x435   :  { %v1225_v11 = vsub.s32 32, %v1224_v2  ;;  %v3851_v35 = vand.u32 3, %v1924_v14  ;;  %v1218_v59 = vor.u32 8388608, %v1217_v13  ;;  %v3858_v45 = vadd.s32 %v3792_v56, %v3809_v44 }
 0x436   :  { %v1088_v52 = vxor.u32 2147483648, %v1087_v57  ;;  %v1170_v30 = vshll.u32 %v3842_v40, 30  ;;  %v1316_v55 = vand.u32 2139095040, %v3836_v27  ;;  %vm1109_vm1 = vcmp.lt.s32.totalorder %v3552_v39, 0 }
 0x437   :  { %v1228_v12 = vshrl.u32 %v4245_v29, %v1225_v11  ;;  %v1231_v33 = vshrl.u32 %v4246_v47, %v1225_v11  ;;  %v1234_v34 = vshrl.u32 %v2796_v54, %v1225_v11  ;;  %v1223_v1 = vshrl.u32 %v1222_v10, 5 }
 0x438   :  { %v1089_v61 = vsel %vm1006_vm14, %v1088_v52, %v1087_v57  ;;  %v3865_v19 = vsub.s32 %v1167_v3, %v1170_v30  ;;  %v1227_v56 = vshll.u32 %v2793_v15, %v1224_v2  ;;  %v1230_v44 = vshll.u32 %v4245_v29, %v1224_v2 }
 0x439   :  { %v1092_v6 = vsel %vm3819_vm0, %v3460_v42, %v1089_v61  ;;  %v1233_v36 = vshll.u32 %v4246_v47, %v1224_v2  ;;  %v1236_v41 = vshll.u32 %v2796_v54, %v1224_v2  ;;  %v1237_v58 = vshrl.u32 %v2797_v62, %v1225_v11 }
 0x43a   :  { %2583 = vcosq.f32 %v1092_v6  ;;  %v1173_v32 = vsub.s32 0, %v3865_v19  ;;  %v1229_v48 = vor.u32 %v1228_v12, %v1227_v56  ;;  %v1239_v51 = vshll.u32 %v2797_v62, %v1224_v2 }
 0x43b   :  { %2585 = vsinq.f32 %v1092_v6  ;;  %v1240_v28 = vshrl.u32 %v4247_v63, %v1225_v11  ;;  %v1232_v43 = vor.u32 %v1231_v33, %v1230_v44  ;;  %v1235_v25 = vor.u32 %v1234_v34, %v1233_v36 }
 0x43c   :  { %v2470_v38 = vmin.u32 %v1173_v32, %v3865_v19  ;;  %v3879_v0 = vshll.u32 %v1218_v59, 8  ;;  %vm1102_vm2 = vcmp.eq.s32.totalorder %v3849_v4, 2  ;;  %vm1930_vm3 = vcmp.eq.s32.totalorder %v3851_v35, 2 }
 0x43d   :  { %v1226_v3 = vshrl.u32 %v2793_v15, %v1225_v11  ;;  %v1238_v50 = vor.u32 %v1237_v58, %v1236_v41  ;;  %v1241_v9 = vor.u32 %v1240_v28, %v1239_v51  ;;  %v1313_v53 = vand.u32 2147483647, %v3836_v27 }
 0x43e   :  { %vm1099_vm4 = vcmp.eq.s32.totalorder %v3849_v4, 0  ;;  %vm1927_vm5 = vcmp.eq.s32.totalorder %v3851_v35, 0  ;;  %v1175_v20 = vclz %v2470_v38  ;;  %v1193_v21 = vsub.s32 4, %v3842_v40 }
 0x43f   :  { %vm1242_vm8 = vcmp.lt.s32.totalorder %v1223_v1, 1  ;;  %v1317_v14 = vshrl.u32 %v1316_v55, 23  ;;  %vm1098_vm9 = vcmp.lt.s32.totalorder %v3849_v4, 2  ;;  %vm1926_vm10 = vcmp.lt.s32.totalorder %v3851_v35, 2 }
 0x440   :  { %vm1243_vm11 = vcmp.lt.s32.totalorder %v1223_v1, 2  ;;  %vm1244_vm13 = vcmp.lt.s32.totalorder %v1223_v1, 3  ;;  %vm1245_vm14 = vcmp.lt.s32.totalorder %v1223_v1, 4  ;;  %v1246_v22 = vsel %vm1242_vm8, %v1226_v3, %v1229_v48 }
 0x441   :  { %vm1096_vm15 = vweird.f32 %v3460_v42  ;;  %v2471_v7 = vadd.s32 4294967294, %v1175_v20  ;;  %v1247_v13 = vsel %vm1245_vm14, %v1235_v25, 2102212464  ;;  %v1250_v10 = vsel %vm1242_vm8, %v1229_v48, %v1232_v43 }
 0x442   :  { %v1251_v57 = vsel %vm1245_vm14, %v1238_v50, 920167782  ;;  %v1248_v2 = vsel %vm1244_vm13, %v1232_v43, %v1247_v13  ;;  %v1254_v11 = vsel %vm1242_vm8, %v1232_v43, %v1235_v25  ;;  %v1255_v30 = vsel %vm1245_vm14, %v1241_v9, 1326507024 }
 0x443   :  { %v1252_v52 = vsel %vm1244_vm13, %v1235_v25, %v1251_v57  ;;  %vm2472_vm0 = vcmp.lt.s32.totalorder %v2471_v7, 0  ;;  %v1194_v59 = vsel %vm1109_vm1, %v1193_v21, %v3842_v40  ;;  %v1256_v12 = vsel %vm1244_vm13, %v1238_v50, %v1255_v30  ;;  %v348_v30 = vpop.permute.xlu1 %347 }
 0x444   :  { %v1253_v61 = vsel %vm1243_vm11, %v1250_v10, %v1252_v52  ;;  %v2584_v55 = vpop.eup %2583  ;;  %v1178_v6 = vsel %vm2472_vm0, 0, %v2471_v7  ;;  %v1257_v33 = vsel %vm1243_vm11, %v1254_v11, %v1256_v12  ;;  %v1249_v48 = vsel %vm1243_vm11, %v1246_v22, %v1248_v2  ;;  %v675_v2 = vld [vmem:[#allocation11 + $0x20] sm:$0xff] }
 0x445   :  { %v3897_v34 = vmul.u32.u64.low %v3879_v0, %v1253_v61  ;;  %v3898_v56 = vmul.u32.u64.high %v3879_v0, %v1253_v61, %v3897_v34  ;;  %v2586_v44 = vpop.eup %2585  ;;  %v1103_v32 = vxor.u32 2147483648, %v2584_v55  ;;  %v1179_v36 = vsub.s32 32, %v1178_v6 }
 0x446   :  { %v1183_v41 = vsub.s32 4294967266, %v1178_v6  ;;  %v1100_v58 = vxor.u32 2147483648, %v2586_v44  ;;  %v1180_v40 = vshll.u32 %v3865_v19, %v1178_v6  ;;  %v2477_v9 = vadd.s32 4294967169, %v1317_v14 }
 0x447   :  { %v3904_v51 = vmul.u32.u64.low %v3879_v0, %v1257_v33  ;;  %v3905_v28 = vmul.u32.u64.high %v3879_v0, %v1257_v33, %v3904_v51  ;;  %v1104_v38 = vsel %vm1102_vm2, %v1103_v32, %v2586_v44  ;;  %v1932_v43 = vsel %vm1930_vm3, %v1103_v32, %v2586_v44 }
 0x448   :  { %v1181_v25 = vshrl.u32 %v3858_v45, %v1179_v36  ;;  %v1184_v3 = vadd.s32 127, %v1183_v41  ;;  %v1101_v1 = vsel %vm1099_vm4, %v2584_v55, %v1100_v58  ;;  %v1929_v50 = vsel %vm1927_vm5, %v2584_v55, %v1100_v58  ;;  %v634_v36 = vld [vmem:[#allocation7 + $0x20] sm:$0xff] }
 0x449   :  { %v1268_v19 = vadd.s32 1, %v3898_v56  ;;  %v1105_v20 = vsel %vm1098_vm9, %v1101_v1, %v1104_v38  ;;  %v1933_v21 = vsel %vm1926_vm10, %v1929_v50, %v1932_v43  ;;  %v1265_v7 = vmul.u32 %v3879_v0, %v1249_v48  ;;  %v667_v41 = vld [vmem:[#allocation8 + $0x20] sm:$0xff] }
 0x44a   :  { %v1185_v22 = vshll.u32 %v1184_v3, 23  ;;  %v1106_v45 = vsel %vm1096_vm15, nan, %v1105_v20  ;;  %v1934_v13 = vsel %vm1096_vm15, nan, %v1933_v21  ;;  %v1182_v10 = vor.u32 %v1181_v25, %v1180_v40 }
 0x44b   :  { %vm1267_vm7 = vc.u32 %v3905_v28, %v3897_v34  ;;  %v2354_v14 = vmul.f32 %v1106_v45, %v3838_v26  ;;  %v2362_v4 = vmul.f32 %v1934_v13, %v3840_v17  ;;  %v2386_v35 = vmul.f32 %v1934_v13, %v3838_v26 }
 0x44c   :  { %v2394_v57 = vmul.f32 %v1106_v45, %v3840_v17  ;;  %vm3934_vm6 = vcmp.le.f32.partialorder %v1107_v5, 0.7853982  ;;  %v1186_v42 = vor.u32 4788187, %v1185_v22  ;;  %v1269_v52 = vsel %vm1267_vm7, %v1268_v19, %v3898_v56 }
 0x44d   :  { %v1323_v11 = vadd.s32 1, %v2477_v9  ;;  %v2370_v61 = vsub.f32 %v2354_v14, %v2362_v4  ;;  %v1196_v55 = vsel %vm3934_vm6, 0, %v1194_v59  ;;  %v1270_v26 = vadd.s32 %v1269_v52, %v1265_v7 }
 0x44e   :  { %v2402_v12 = vadd.f32 %v2394_v57, %v2386_v35  ;;  %v683_v17 = vmul.f32 %v675_v2, %v3340_v24  ;;  %v1187_v6 = vand.u32 2147483647, %v1186_v42  ;;  %v1189_v33 = vcvt.s32.f32 %v1182_v10 }
 0x44f   :  { %vm1324_vm2 = vcmp.gt.s32.totalorder %v1323_v11, 0  ;;  %2378 = vst [vmem:[#allocation14 + $0x18] sm:$0xff] %v2370_v61  ;;  %v1271_v5 = vadd.s32 536870912, %v1270_v26  ;;  %v1320_v44 = vand.u32 8388607, %v1313_v53  ;;  %v356_v32 = vsel %vm332_vm12, %v348_v30, 0.0 }
 0x450   :  { %2410 = vst [vmem:[#allocation15 + $0x18] sm:$0xff] %v2402_v12  ;;  %v1325_v56 = vsel %vm1324_vm2, %v1323_v11, 0  ;;  %v1190_v48 = vmul.f32 %v1189_v33, %v1187_v6  ;;  %v2028_v59 = vadd.s32 3, %v1196_v55  ;;  %v364_v43 = vadd.f32 %v356_v32, %v3222_v8 }
 0x451   :  { %v1327_v58 = vand.u32 31, %v1325_v56  ;;  %v3946_v40 = vshrl.u32 %v1271_v5, 30  ;;  %v602_v25 = vadd.f32 %v3307_v37, %v592_v49  ;;  %v3954_v3 = vadd.f32 %v3845_v46, %v634_v36 }
 0x452   :  { %v1191_v51 = vxor.u32 2147483648, %v1190_v48  ;;  %v3956_v18 = vadd.f32 %v683_v17, %v667_v41  ;;  %v1321_v50 = vor.u32 8388608, %v1320_v44  ;;  %v3961_v9 = vand.u32 3, %v1196_v55 }
 0x453   :  { %v1328_v38 = vsub.s32 32, %v1327_v58  ;;  %v1273_v1 = vshll.u32 %v3946_v40, 30  ;;  %v3963_v20 = vand.u32 3, %v2028_v59  ;;  %v1326_v49 = vshrl.u32 %v1325_v56, 5 }
 0x454   :  { %v1192_v19 = vsel %vm1109_vm1, %v1191_v51, %v1190_v48  ;;  %v1330_v21 = vshll.u32 %v2793_v15, %v1327_v58  ;;  %v3974_v22 = vadd.f32 %v602_v25, %v364_v43  ;;  %v1333_v45 = vshll.u32 %v4245_v29, %v1327_v58 }
 0x455   :  { %v1331_v8 = vshrl.u32 %v4245_v29, %v1328_v38  ;;  %v1195_v60 = vsel %vm3934_vm6, %v3552_v39, %v1192_v19  ;;  %v3969_v16 = vsub.s32 %v1270_v26, %v1273_v1  ;;  %v1334_v37 = vshrl.u32 %v4246_v47, %v1328_v38 }
 0x456   :  { %v1337_v46 = vshrl.u32 %v2796_v54, %v1328_v38  ;;  %2587 = vcosq.f32 %v1195_v60  ;;  %v1336_v13 = vshll.u32 %v4246_v47, %v1327_v58  ;;  %v1339_v10 = vshll.u32 %v2796_v54, %v1327_v58 }
 0x457   :  { %2589 = vsinq.f32 %v1195_v60  ;;  %v1276_v7 = vsub.s32 0, %v3969_v16  ;;  %v1340_v14 = vshrl.u32 %v2797_v62, %v1328_v38  ;;  %v1342_v4 = vshll.u32 %v2797_v62, %v1327_v58 }
 0x458   :  { %v1343_v35 = vshrl.u32 %v4247_v63, %v1328_v38  ;;  %v1332_v2 = vor.u32 %v1331_v8, %v1330_v21  ;;  %v1335_v0 = vor.u32 %v1334_v37, %v1333_v45  ;;  %v1338_v42 = vor.u32 %v1337_v46, %v1336_v13 }
 0x459   :  { %v2474_v57 = vmin.u32 %v1276_v7, %v3969_v16  ;;  %vm1205_vm12 = vcmp.eq.s32.totalorder %v3961_v9, 2  ;;  %vm2034_vm1 = vcmp.eq.s32.totalorder %v3963_v20, 2  ;;  %v1266_v52 = vadd.s32 %v3897_v34, %v3905_v28 }
 0x45a   :  { %v1341_v11 = vor.u32 %v1340_v14, %v1339_v10  ;;  %v1344_v30 = vor.u32 %v1343_v35, %v1342_v4  ;;  %vm1202_vm3 = vcmp.eq.s32.totalorder %v3961_v9, 0  ;;  %vm2031_vm4 = vcmp.eq.s32.totalorder %v3963_v20, 0 }
 0x45b   :  { %v1278_v61 = vclz %v2474_v57  ;;  %v1329_v12 = vshrl.u32 %v2793_v15, %v1328_v38  ;;  %v3991_v55 = vshll.u32 %v1321_v50, 8  ;;  %v1419_v26 = vand.u32 2139095040, %v3974_v22 }
 0x45c   :  { %vm1201_vm5 = vcmp.lt.s32.totalorder %v3961_v9, 2  ;;  %vm2030_vm8 = vcmp.lt.s32.totalorder %v3963_v20, 2  ;;  %vm1345_vm9 = vcmp.lt.s32.totalorder %v1326_v49, 1  ;;  %vm1346_vm10 = vcmp.lt.s32.totalorder %v1326_v49, 2 }
 0x45d   :  { %vm1347_vm11 = vcmp.lt.s32.totalorder %v1326_v49, 3  ;;  %vm1348_vm13 = vcmp.lt.s32.totalorder %v1326_v49, 4  ;;  %vm1199_vm14 = vweird.f32 %v3552_v39  ;;  %v2475_v34 = vadd.s32 4294967294, %v1278_v61 }
 0x45e   :  { %v1350_v28 = vsel %vm1348_vm13, %v1338_v42, 2102212464  ;;  %v1353_v17 = vsel %vm1345_vm9, %v1332_v2, %v1335_v0  ;;  %v1354_v6 = vsel %vm1348_vm13, %v1341_v11, 920167782  ;;  %v1349_v33 = vsel %vm1345_vm9, %v1329_v12, %v1332_v2 }
 0x45f   :  { %v1355_v5 = vsel %vm1347_vm11, %v1338_v42, %v1354_v6  ;;  %v1357_v44 = vsel %vm1345_vm9, %v1335_v0, %v1338_v42  ;;  %v1358_v56 = vsel %vm1348_vm13, %v1344_v30, 1326507024  ;;  %vm1212_vm15 = vcmp.lt.s32.totalorder %v3783_v23, 0 }
 0x460   :  { %vm2476_vm0 = vcmp.lt.s32.totalorder %v2475_v34, 0  ;;  %v1351_v32 = vsel %vm1347_vm11, %v1335_v0, %v1350_v28  ;;  %v1356_v36 = vsel %vm1346_vm10, %v1353_v17, %v1355_v5  ;;  %v1359_v41 = vsel %vm1347_vm11, %v1341_v11, %v1358_v56  ;;  %v2588_v48 = vpop.eup %2587 }
 0x461   :  { %v1281_v59 = vsel %vm2476_vm0, 0, %v2475_v34  ;;  %v1360_v58 = vsel %vm1346_vm10, %v1357_v44, %v1359_v41  ;;  %v4001_v51 = vmul.u32.u64.low %v3991_v55, %v1356_v36  ;;  %v4002_v38 = vmul.u32.u64.high %v3991_v55, %v1356_v36, %v4001_v51  ;;  %v2590_v43 = vpop.eup %2589  ;;  %v643_v36 = vld [vmem:[#allocation10 + $0x28] sm:$0xff] }
 0x462   :  { %v1206_v25 = vxor.u32 2147483648, %v2588_v48  ;;  %v1282_v1 = vsub.s32 32, %v1281_v59  ;;  %v1286_v50 = vsub.s32 4294967266, %v1281_v59  ;;  %v1296_v19 = vsub.s32 4, %v3946_v40 }
 0x463   :  { %v1203_v8 = vxor.u32 2147483648, %v2590_v43  ;;  %v1352_v60 = vsel %vm1346_vm10, %v1349_v33, %v1351_v32  ;;  %v4008_v37 = vmul.u32.u64.low %v3991_v55, %v1360_v58  ;;  %v4009_v46 = vmul.u32.u64.high %v3991_v55, %v1360_v58, %v4008_v37 }
 0x464   :  { %v1207_v21 = vsel %vm1205_vm12, %v1206_v25, %v2590_v43  ;;  %v2036_v7 = vsel %vm2034_vm1, %v1206_v25, %v2590_v43  ;;  %v1284_v45 = vshrl.u32 %v1266_v52, %v1282_v1  ;;  %v1287_v13 = vadd.s32 127, %v1286_v50  ;;  %v668_v37 = vld [vmem:[#allocation8 + $0x28] sm:$0xff] }
 0x465   :  { %v1204_v10 = vsel %vm1202_vm3, %v2588_v48, %v1203_v8  ;;  %v2033_v14 = vsel %vm2031_vm4, %v2588_v48, %v1203_v8  ;;  %v1283_v49 = vshll.u32 %v3969_v16, %v1281_v59  ;;  %v1371_v4 = vadd.s32 1, %v4002_v38 }
 0x466   :  { %v1208_v35 = vsel %vm1201_vm5, %v1204_v10, %v1207_v21  ;;  %v2037_v57 = vsel %vm2030_vm8, %v2033_v14, %v2036_v7  ;;  %v1288_v2 = vshll.u32 %v1287_v13, 23  ;;  %v1368_v0 = vmul.u32 %v3991_v55, %v1352_v60  ;;  %v635_v60 = vld [vmem:[#allocation7 + $0x28] sm:$0xff] }
 0x467   :  { %v1209_v42 = vsel %vm1199_vm14, nan, %v1208_v35  ;;  %v2038_v52 = vsel %vm1199_vm14, nan, %v2037_v57  ;;  %v1285_v11 = vor.u32 %v1284_v45, %v1283_v49  ;;  %vm1370_vm7 = vc.u32 %v4009_v46, %v4001_v51 }
 0x468   :  { %v2355_v16 = vmul.f32 %v1209_v42, %v3954_v3  ;;  %v2363_v9 = vmul.f32 %v2038_v52, %v3956_v18  ;;  %v2387_v20 = vmul.f32 %v2038_v52, %v3954_v3  ;;  %v2395_v30 = vmul.f32 %v1209_v42, %v3956_v18 }
 0x469   :  { %v1289_v61 = vor.u32 4788187, %v1288_v2  ;;  %v1297_v12 = vsel %vm1212_vm15, %v1296_v19, %v3946_v40  ;;  %v1372_v39 = vsel %vm1370_vm7, %v1371_v4, %v4002_v38  ;;  %v1420_v55 = vshrl.u32 %v1419_v26, 23 }
 0x46a   :  { %v2371_v34 = vsub.f32 %v2355_v16, %v2363_v9  ;;  %v2403_v28 = vadd.f32 %v2395_v30, %v2387_v20  ;;  %v1373_v17 = vadd.s32 %v1372_v39, %v1368_v0  ;;  %vm4042_vm6 = vcmp.le.f32.partialorder %v1210_v31, 0.7853982  ;;  %v676_v31 = vld [vmem:[#allocation11 + $0x28] sm:$0xff] }
 0x46b   :  { %v1290_v3 = vand.u32 2147483647, %v1289_v61  ;;  %v1292_v33 = vcvt.s32.f32 %v1285_v11  ;;  %v2481_v18 = vadd.s32 4294967169, %v1420_v55  ;;  %v1299_v40 = vsel %vm4042_vm6, 0, %v1297_v12 }
 0x46c   :  { %2379 = vst [vmem:[#allocation14 + $0x20] sm:$0xff] %v2371_v34  ;;  %2411 = vst [vmem:[#allocation15 + $0x20] sm:$0xff] %v2403_v28  ;;  %v1374_v5 = vadd.s32 536870912, %v1373_v17  ;;  %v1416_v26 = vand.u32 2147483647, %v3974_v22  ;;  %v2132_v48 = vadd.s32 3, %v1299_v40  ;;  %v652_v1 = vmul.f32 %v3340_v24, %v643_v36 }
 0x46d   :  { %v1293_v44 = vmul.f32 %v1292_v33, %v1290_v3  ;;  %v1426_v56 = vadd.s32 1, %v2481_v18  ;;  %v684_v50 = vmul.f32 %v676_v31, %v3340_v24  ;;  %v4063_v21 = vand.u32 3, %v1299_v40 }
 0x46e   :  { %v4049_v32 = vshrl.u32 %v1374_v5, 30  ;;  %v1423_v43 = vand.u32 8388607, %v1416_v26  ;;  %v4065_v7 = vand.u32 3, %v2132_v48  ;;  %v4068_v14 = vadd.f32 %v652_v1, %v635_v60 }
 0x46f   :  { %v1294_v41 = vxor.u32 2147483648, %v1293_v44  ;;  %vm1427_vm2 = vcmp.gt.s32.totalorder %v1426_v56, 0  ;;  %v4070_v49 = vadd.f32 %v684_v50, %v668_v37  ;;  %vm1308_vm12 = vcmp.eq.s32.totalorder %v4063_v21, 2 }
 0x470   :  { %v1376_v59 = vshll.u32 %v4049_v32, 30  ;;  %v1428_v58 = vsel %vm1427_vm2, %v1426_v56, 0  ;;  %v1424_v10 = vor.u32 8388608, %v1423_v43  ;;  %vm2138_vm1 = vcmp.eq.s32.totalorder %v4065_v7, 2 }
 0x471   :  { %v1295_v38 = vsel %vm1212_vm15, %v1294_v41, %v1293_v44  ;;  %v1430_v25 = vand.u32 31, %v1428_v58  ;;  %v4075_v35 = vshrl.u32 %v1428_v58, 5  ;;  %vm1305_vm3 = vcmp.eq.s32.totalorder %v4063_v21, 0 }
 0x472   :  { %v1298_v19 = vsel %vm4042_vm6, %v3783_v23, %v1295_v38  ;;  %v4061_v8 = vsub.s32 %v1373_v17, %v1376_v59  ;;  %vm2135_vm4 = vcmp.eq.s32.totalorder %v4065_v7, 0  ;;  %vm1304_vm5 = vcmp.lt.s32.totalorder %v4063_v21, 2 }
 0x473   :  { %2591 = vcosq.f32 %v1298_v19  ;;  %v1431_v45 = vsub.s32 32, %v1430_v25  ;;  %v1439_v0 = vshll.u32 %v4246_v47, %v1430_v25  ;;  %v1442_v11 = vshll.u32 %v2796_v54, %v1430_v25 }
 0x474   :  { %2593 = vsinq.f32 %v1298_v19  ;;  %v1379_v13 = vsub.s32 0, %v4061_v8  ;;  %vm2134_vm8 = vcmp.lt.s32.totalorder %v4065_v7, 2  ;;  %v1369_v9 = vadd.s32 %v4001_v51, %v4009_v46 }
 0x475   :  { %v1434_v57 = vshrl.u32 %v4245_v29, %v1431_v45  ;;  %v1437_v2 = vshrl.u32 %v4246_v47, %v1431_v45  ;;  %v1440_v52 = vshrl.u32 %v2796_v54, %v1431_v45  ;;  %v1443_v16 = vshrl.u32 %v2797_v62, %v1431_v45 }
 0x476   :  { %v2478_v4 = vmin.u32 %v1379_v13, %v4061_v8  ;;  %v1433_v47 = vshll.u32 %v2793_v15, %v1430_v25  ;;  %v1436_v20 = vshll.u32 %v4245_v29, %v1430_v25  ;;  %v4091_v30 = vshll.u32 %v1424_v10, 8 }
 0x477   :  { %vm1302_vm9 = vweird.f32 %v3783_v23  ;;  %v1441_v12 = vor.u32 %v1440_v52, %v1439_v0  ;;  %v1444_v54 = vor.u32 %v1443_v16, %v1442_v11  ;;  %v1446_v39 = vshrl.u32 %v4247_v63, %v1431_v45 }
 0x478   :  { %v1381_v42 = vclz %v2478_v4  ;;  %v1432_v55 = vshrl.u32 %v2793_v15, %v1431_v45  ;;  %v1435_v34 = vor.u32 %v1434_v57, %v1433_v47  ;;  %v1438_v28 = vor.u32 %v1437_v2, %v1436_v20 }
 0x479   :  { %v1445_v17 = vshll.u32 %v2797_v62, %v1430_v25  ;;  %vm1448_vm11 = vcmp.lt.s32.totalorder %v4075_v35, 1  ;;  %vm1449_vm13 = vcmp.lt.s32.totalorder %v4075_v35, 2  ;;  %vm1451_vm14 = vcmp.lt.s32.totalorder %v4075_v35, 4 }
 0x47a   :  { %v2479_v61 = vadd.s32 4294967294, %v1381_v42  ;;  %vm1450_vm15 = vcmp.lt.s32.totalorder %v4075_v35, 3  ;;  %v1457_v63 = vsel %vm1451_vm14, %v1444_v54, 920167782  ;;  %v1453_v62 = vsel %vm1451_vm14, %v1441_v12, 2102212464 }
 0x47b   :  { %v1447_v46 = vor.u32 %v1446_v39, %v1445_v17  ;;  %v1456_v5 = vsel %vm1448_vm11, %v1435_v34, %v1438_v28  ;;  %v1458_v44 = vsel %vm1450_vm15, %v1441_v12, %v1457_v63  ;;  %v1460_v58 = vsel %vm1448_vm11, %v1438_v28, %v1441_v12  ;;  %v677_v63 = vld [vmem:[#allocation11 + $0x30] sm:$0xff] }
 0x47c   :  { %vm2480_vm10 = vcmp.lt.s32.totalorder %v2479_v61, 0  ;;  %v1459_v50 = vsel %vm1449_vm13, %v1456_v5, %v1458_v44  ;;  %v1452_v4 = vsel %vm1448_vm11, %v1432_v55, %v1435_v34  ;;  %v1454_v23 = vsel %vm1450_vm15, %v1438_v28, %v1453_v62 }
 0x47d   :  { %v2592_v29 = vpop.eup %2591  ;;  %v1384_v51 = vsel %vm2480_vm10, 0, %v2479_v61  ;;  %v1461_v38 = vsel %vm1451_vm14, %v1447_v46, 1326507024  ;;  %v1399_v47 = vsub.s32 4, %v4049_v32  ;;  %v1455_v20 = vsel %vm1449_vm13, %v1452_v4, %v1454_v23  ;;  %v644_v46 = vld [vmem:[#allocation10 + $0x30] sm:$0xff] }
 0x47e   :  { %v2594_v15 = vpop.eup %2593  ;;  %v1309_v6 = vxor.u32 2147483648, %v2592_v29  ;;  %v1385_v3 = vsub.s32 32, %v1384_v51  ;;  %v1389_v33 = vsub.s32 4294967266, %v1384_v51  ;;  %v1386_v40 = vshll.u32 %v4061_v8, %v1384_v51 }
 0x47f   :  { %v1306_v18 = vxor.u32 2147483648, %v2594_v15  ;;  %v1462_v37 = vsel %vm1450_vm15, %v1444_v54, %v1461_v38  ;;  %vm1315_vm7 = vcmp.lt.s32.totalorder %v3836_v27, 0  ;;  %v1471_v54 = vmul.u32 %v4091_v30, %v1455_v20 }
 0x480   :  { %v1310_v56 = vsel %vm1308_vm12, %v1309_v6, %v2594_v15  ;;  %v2140_v36 = vsel %vm2138_vm1, %v1309_v6, %v2594_v15  ;;  %v1387_v31 = vshrl.u32 %v1369_v9, %v1385_v3  ;;  %v1390_v41 = vadd.s32 127, %v1389_v33  ;;  %v636_v3 = vld [vmem:[#allocation7 + $0x30] sm:$0xff] }
 0x481   :  { %v1307_v48 = vsel %vm1305_vm3, %v2592_v29, %v1306_v18  ;;  %v2137_v59 = vsel %vm2135_vm4, %v2592_v29, %v1306_v18  ;;  %v1463_v57 = vsel %vm1449_vm13, %v1460_v58, %v1462_v37  ;;  %vm1314_vm6 = vcmp.le.f32.partialorder %v1313_v53, 0.7853982  ;;  %v669_v33 = vld [vmem:[#allocation8 + $0x30] sm:$0xff] }
 0x482   :  { %v1311_v43 = vsel %vm1304_vm5, %v1307_v48, %v1310_v56  ;;  %v2141_v25 = vsel %vm2134_vm8, %v2137_v59, %v2140_v36  ;;  %v1391_v1 = vshll.u32 %v1390_v41, 23  ;;  %v1388_v60 = vor.u32 %v1387_v31, %v1386_v40 }
 0x483   :  { %v1312_v19 = vsel %vm1302_vm9, nan, %v1311_v43  ;;  %v2142_v8 = vsel %vm1302_vm9, nan, %v2141_v25  ;;  %v4145_v42 = vmul.u32.u64.low %v4091_v30, %v1463_v57  ;;  %v4146_v52 = vmul.u32.u64.high %v4091_v30, %v1463_v57, %v4145_v42 }
 0x484   :  { %v2356_v21 = vmul.f32 %v1312_v19, %v4068_v14  ;;  %v2364_v45 = vmul.f32 %v2142_v8, %v4070_v49  ;;  %v2388_v7 = vmul.f32 %v2142_v8, %v4068_v14  ;;  %v2396_v13 = vmul.f32 %v1312_v19, %v4070_v49 }
 0x485   :  { %v1392_v10 = vor.u32 4788187, %v1391_v1  ;;  %v1395_v14 = vcvt.s32.f32 %v1388_v60  ;;  %v4149_v49 = vmul.u32.u64.low %v4091_v30, %v1459_v50  ;;  %v4150_v16 = vmul.u32.u64.high %v4091_v30, %v1459_v50, %v4149_v49 }
 0x486   :  { %v2372_v2 = vsub.f32 %v2356_v21, %v2364_v45  ;;  %v2404_v0 = vadd.f32 %v2396_v13, %v2388_v7  ;;  %v1400_v55 = vsel %vm1315_vm7, %v1399_v47, %v4049_v32  ;;  %v653_v53 = vmul.f32 %v3340_v24, %v644_v46 }
 0x487   :  { %v1393_v11 = vand.u32 2147483647, %v1392_v10  ;;  %vm1473_vm0 = vc.u32 %v4146_v52, %v4149_v49  ;;  %v1474_v12 = vadd.s32 1, %v4150_v16  ;;  %v1402_v17 = vsel %vm1314_vm6, 0, %v1400_v55  ;;  %v645_v55 = vld [vmem:[#allocation10 + $0x38] sm:$0xff] }
 0x488   :  { %2380 = vst [vmem:[#allocation14 + $0x28] sm:$0xff] %v2372_v2  ;;  %2412 = vst [vmem:[#allocation15 + $0x28] sm:$0xff] %v2404_v0  ;;  %v2236_v30 = vadd.s32 3, %v1402_v17  ;;  %v685_v32 = vmul.f32 %v677_v63, %v3340_v24  ;;  %v1406_v62 = vand.u32 3, %v1402_v17  ;;  %v661_v56 = vadd.f32 %v653_v53, %v636_v3  ;;  %v637_v17 = vld [vmem:[#allocation7 + $0x38] sm:$0xff] }
 0x489   :  { %v1396_v9 = vmul.f32 %v1395_v14, %v1393_v11  ;;  %v1475_v34 = vsel %vm1473_vm0, %v1474_v12, %v4150_v16  ;;  %vm1405_vm8 = vweird.f32 %v3836_v27  ;;  %v1472_v23 = vadd.s32 %v4149_v49, %v4146_v52 }
 0x48a   :  { %v1476_v28 = vadd.s32 %v1475_v34, %v1471_v54  ;;  %v2237_v18 = vand.u32 3, %v2236_v30  ;;  %v693_v36 = vadd.f32 %v685_v32, %v669_v33  ;;  %vm1408_vm2 = vcmp.eq.s32.totalorder %v1406_v62, 0  ;;  %v670_v30 = vld [vmem:[#allocation8 + $0x38] sm:$0xff] }
 0x48b   :  { %v1397_v61 = vxor.u32 2147483648, %v1396_v9  ;;  %vm1411_vm12 = vcmp.eq.s32.totalorder %v1406_v62, 2  ;;  %vm1407_vm4 = vcmp.lt.s32.totalorder %v1406_v62, 2  ;;  %vm1418_vm10 = vcmp.lt.s32.totalorder %v3974_v22, 0 }
 0x48c   :  { %v1477_v29 = vadd.s32 536870912, %v1476_v28  ;;  %vm2242_vm1 = vcmp.eq.s32.totalorder %v2237_v18, 2  ;;  %vm2239_vm3 = vcmp.eq.s32.totalorder %v2237_v18, 0  ;;  %vm2238_vm5 = vcmp.lt.s32.totalorder %v2237_v18, 2 }
 0x48d   :  { %v1398_v39 = vsel %vm1315_vm7, %v1397_v61, %v1396_v9  ;;  %vm1417_vm11 = vcmp.le.f32.partialorder %v1416_v26, 0.7853982 }
 0x48e   :  { %v1401_v35 = vsel %vm1314_vm6, %v3836_v27, %v1398_v39  ;;  %v4166_v51 = vshrl.u32 %v1477_v29, 30 }
 0x48f   :  { %2595 = vcosq.f32 %v1401_v35 }
 0x490   :  { %2597 = vsinq.f32 %v1401_v35  ;;  %v1479_v15 = vshll.u32 %v4166_v51, 30  ;;  %v1502_v61 = vsub.s32 4, %v4166_v51  ;;  %v678_v35 = vld [vmem:[#allocation11 + $0x38] sm:$0xff] }
 0x491   :  { %v686_v29 = vmul.f32 %v678_v35, %v3340_v24 }
 0x492   :  { %v1480_v6 = vsub.s32 %v1476_v28, %v1479_v15  ;;  %v1503_v49 = vsel %vm1418_vm10, %v1502_v61, %v4166_v51  ;;  %v654_v28 = vmul.f32 %v3340_v24, %v645_v55 }
 0x493   :  { %v1505_v39 = vsel %vm1417_vm11, 0, %v1503_v49  ;;  %v694_v32 = vadd.f32 %v686_v29, %v670_v30 }
 0x494   :  { %v1482_v40 = vsub.s32 0, %v1480_v6  ;;  %v2340_v34 = vadd.s32 3, %v1505_v39  ;;  %v1509_v46 = vand.u32 3, %v1505_v39  ;;  %v662_v53 = vadd.f32 %v654_v28, %v637_v17 }
 0x496   :  { %v2482_v41 = vmin.u32 %v1482_v40, %v1480_v6  ;;  %v2341_v63 = vand.u32 3, %v2340_v34  ;;  %vm1514_vm13 = vcmp.eq.s32.totalorder %v1509_v46, 2  ;;  %vm1511_vm15 = vcmp.eq.s32.totalorder %v1509_v46, 0 }
 0x497   :  { %vm1510_vm7 = vcmp.lt.s32.totalorder %v1509_v46, 2 }
 0x498   :  { %v1484_v38 = vclz %v2482_v41  ;;  %vm2346_vm14 = vcmp.eq.s32.totalorder %v2341_v63, 2  ;;  %vm2343_vm0 = vcmp.eq.s32.totalorder %v2341_v63, 0  ;;  %vm2342_vm6 = vcmp.lt.s32.totalorder %v2341_v63, 2 }
 0x499   :  { %v2596_v5 = vpop.eup %2595 }
 0x49a   :  { %v2598_v44 = vpop.eup %2597  ;;  %v1412_v31 = vxor.u32 2147483648, %v2596_v5  ;;  %v2483_v19 = vadd.s32 4294967294, %v1484_v38 }
 0x49b   :  { %v1409_v48 = vxor.u32 2147483648, %v2598_v44 }
 0x49c   :  { %v1413_v59 = vsel %vm1411_vm12, %v1412_v31, %v2598_v44  ;;  %v2244_v58 = vsel %vm2242_vm1, %v1412_v31, %v2598_v44  ;;  %vm2484_vm9 = vcmp.lt.s32.totalorder %v2483_v19, 0 }
 0x49d   :  { %v1410_v43 = vsel %vm1408_vm2, %v2596_v5, %v1409_v48  ;;  %v2241_v25 = vsel %vm2239_vm3, %v2596_v5, %v1409_v48  ;;  %v1487_v4 = vsel %vm2484_vm9, 0, %v2483_v19  ;;  %vm1508_vm2 = vweird.f32 %v3974_v22 }
 0x49e   :  { %v1414_v1 = vsel %vm1407_vm4, %v1410_v43, %v1413_v59  ;;  %v2245_v50 = vsel %vm2238_vm5, %v2241_v25, %v2244_v58  ;;  %v1488_v57 = vsub.s32 32, %v1487_v4  ;;  %v1492_v2 = vsub.s32 4294967266, %v1487_v4 }
 0x49f   :  { %v1415_v8 = vsel %vm1405_vm8, nan, %v1414_v1  ;;  %v2246_v60 = vsel %vm1405_vm8, nan, %v2245_v50  ;;  %v1489_v27 = vshll.u32 %v1480_v6, %v1487_v4 }
 0x4a0   :  { %v2357_v37 = vmul.f32 %v1415_v8, %v661_v56  ;;  %v2365_v21 = vmul.f32 %v2246_v60, %v693_v36  ;;  %v2389_v45 = vmul.f32 %v2246_v60, %v661_v56  ;;  %v2397_v7 = vmul.f32 %v1415_v8, %v693_v36 }
 0x4a1   :  { %v1490_v0 = vshrl.u32 %v1472_v23, %v1488_v57  ;;  %v1493_v42 = vadd.s32 127, %v1492_v2 }
 0x4a2   :  { %v2373_v13 = vsub.f32 %v2357_v37, %v2365_v21  ;;  %v2405_v10 = vadd.f32 %v2397_v7, %v2389_v45 }
 0x4a3   :  { %v1491_v11 = vor.u32 %v1490_v0, %v1489_v27  ;;  %v1494_v14 = vshll.u32 %v1493_v42, 23 }
 0x4a4   :  { %2381 = vst [vmem:[#allocation14 + $0x30] sm:$0xff] %v2373_v13  ;;  %2413 = vst [vmem:[#allocation15 + $0x30] sm:$0xff] %v2405_v10 }
 0x4a5   :  { %v1495_v16 = vor.u32 4788187, %v1494_v14  ;;  %v1498_v47 = vcvt.s32.f32 %v1491_v11 }
 0x4a7   :  { %v1496_v9 = vand.u32 2147483647, %v1495_v16 }
 0x4a9   :  { %v1499_v20 = vmul.f32 %v1498_v47, %v1496_v9 }
 0x4ab   :  { %v1500_v12 = vxor.u32 2147483648, %v1499_v20 }
 0x4ad   :  { %v1501_v52 = vsel %vm1418_vm10, %v1500_v12, %v1499_v20 }
 0x4ae   :  { %v1504_v54 = vsel %vm1417_vm11, %v3974_v22, %v1501_v52 }
 0x4af   :  { %2599 = vcosq.f32 %v1504_v54 }
 0x4b0   :  { %2601 = vsinq.f32 %v1504_v54 }
 0x4b9   :  { %v2600_v26 = vpop.eup %2599 }
 0x4ba   :  { %v2602_v15 = vpop.eup %2601  ;;  %v1515_v51 = vxor.u32 2147483648, %v2600_v26 }
 0x4bb   :  { %v1512_v6 = vxor.u32 2147483648, %v2602_v15 }
 0x4bc   :  { %v1516_v3 = vsel %vm1514_vm13, %v1515_v51, %v2602_v15  ;;  %v2348_v33 = vsel %vm2346_vm14, %v1515_v51, %v2602_v15 }
 0x4bd   :  { %v1513_v62 = vsel %vm1511_vm15, %v2600_v26, %v1512_v6  ;;  %v2345_v18 = vsel %vm2343_vm0, %v2600_v26, %v1512_v6 }
 0x4be   :  { %v1517_v24 = vsel %vm1510_vm7, %v1513_v62, %v1516_v3  ;;  %v2349_v40 = vsel %vm2342_vm6, %v2345_v18, %v2348_v33 }
 0x4bf   :  { %v1518_v5 = vsel %vm1508_vm2, nan, %v1517_v24  ;;  %v2350_v44 = vsel %vm1508_vm2, nan, %v2349_v40 }
 0x4c0   :  { %v2358_v56 = vmul.f32 %v1518_v5, %v662_v53  ;;  %v2366_v36 = vmul.f32 %v2350_v44, %v694_v32  ;;  %v2390_v31 = vmul.f32 %v2350_v44, %v662_v53  ;;  %v2398_v41 = vmul.f32 %v1518_v5, %v694_v32 }
 0x4c2   :  { %v2374_v48 = vsub.f32 %v2358_v56, %v2366_v36  ;;  %v2406_v59 = vadd.f32 %v2398_v41, %v2390_v31 }
 0x4c4   :  { %2382 = vst [vmem:[#allocation14 + $0x38] sm:$0xff] %v2374_v48  ;;  %2414 = vst [vmem:[#allocation15 + $0x38] sm:$0xff] %v2406_v59 }
 0x4c5   :  { %2734 = shalt.err (!%p2731_p5)
}
 0x4c6   :  { %s2735_s4 = scalar_lea.hbm %s4226_s6, 1024 }
 0x4c7   :  { %p2736_p6 = scmp.ne.s32.totalorder %s4226_s6, %s2735_s4  ;;  %p2739_p7 = scmp.lt.u32.totalorder %s2735_s4, %s4226_s6 }
 0x4c9   :  { %p2741_p8 = pnand %p2739_p7, %p2736_p6 }
 0x4cb   :  { %2744 = shalt.err (!%p2741_p8)
}
 0x4cc   :  { %2426 = dma.vmem_to_hbm [thread:$0]  %s2421_s9, 1024, %s4226_s6, [#allocation5], %s2781_s13, %s2781_s13, %s2782_s14  }
 0x4cd   :  { %s2745_s22 = scalar_lea.vmem %s4183_s11, 1024  ;;  %p2750_p10 = scmp.lt.s32.totalorder %s4183_s11, %s4183_s11 }
 0x4ce   :  { %p2746_p9 = scmp.ne.s32.totalorder %s4183_s11, %s2745_s22  ;;  %p2751_p11 = scmp.lt.s32.totalorder %s2745_s22, %s2745_s22 }
 0x4d0   :  { %p2752_p12 = por %p2751_p11, %p2750_p10 }
 0x4d2   :  { %p2753_p13 = pnand %p2752_p12, %p2746_p9 }
 0x4d4   :  { %2756 = shalt.err (!%p2753_p13)
}
 0x4d5   :  { %s2757_s17 = scalar_lea.hbm %s4227_s7, 1024 }
 0x4d6   :  { %p2758_p0 = scmp.ne.s32.totalorder %s4227_s7, %s2757_s17  ;;  %p2761_p1 = scmp.lt.u32.totalorder %s2757_s17, %s4227_s7 }
 0x4d8   :  { %p2763_p2 = pnand %p2761_p1, %p2758_p0 }
 0x4da   :  { %2766 = shalt.err (!%p2763_p2)
}
 0x4db   :  { %2438 = dma.vmem_to_hbm [thread:$0]  %s4183_s11, 1024, %s4227_s7, [#allocation16], %s2781_s13, %s2781_s13, %s2782_s14  }
 0x4dc   :  { %2775 = dma.done.wait [#allocation5], 1024  }
 0x4dd   :  { %2776 = vsyncadd [#allocation5], 4294966272 }
 0x4de   :  { %2777 = dma.done.wait [#allocation16], 1024  }
 0x4df   :  { %2778 = vsyncadd [#allocation16], 4294966272 }
 0x4e0   :  { %2445 = vsyncpa [#allocation4], 1 }
 0x4e1   :  { %2446 = vsyncpa [#allocation9], 1 }
 0x4e2   :  { %2447 = vsyncpa [#allocation12], 1 }
 0x4e3   :  { %2448 = vsyncpa [#allocation5], 1 }
 0x4e4   :  { %2449 = vsyncpa [#allocation16], 1 }
 0x4e5   :  { %2450 = vsyncpa [#allocation6], 1 }

</bundles_post_ra>
